<compile_context>
chip_gen: v7x
topology: tpu7x:2x2x1
jax: 0.10.0
libtpu: 0.0.40
codegen_flags: <defaults>
</compile_context>

<pallas_src>
import functools

import jax
import jax.numpy as jnp
from jax import lax
from jax.experimental import pallas as pl
from jax.experimental.pallas import tpu as pltpu

LN_EPS = 1e-5            # GPT2 layer_norm_epsilon default
_MASK_VALUE = -1e30      # large-negative causal mask (avoids inf-inf NaNs)


# ----------------------------------------------------------------------------
# small helpers
# ----------------------------------------------------------------------------
def _round_up(x, m):
    return ((x + m - 1) // m) * m


def _col_tile(n):
    # lane-dense output tiles: multiples of 128 when possible, else full width
    return min(n, 512) if n % 128 == 0 else n


def _row_tile(m, k, n):
    tn = _col_tile(n)
    tm = 16
    for cand in (512, 256, 128, 64, 32, 16):
        # rough double-buffered VMEM budget: f32 x tile + f32 out/residual tiles + bf16 weight tile
        if 2 * (4 * cand * k + 8 * cand * tn + 2 * k * tn) <= 12 * (1 << 20):
            tm = cand
            break
    return min(tm, _round_up(m, 16))


def _seq_tile(t):
    for c in (256, 128):
        if t % c == 0:
            return c
    return t   # full sequence block (always legal: equals the array dim)


def _cp(*sem):
    return pltpu.CompilerParams(dimension_semantics=sem,
                                vmem_limit_bytes=32 * 1024 * 1024)


def _layernorm_f32(x, gamma, beta):
    mu = jnp.mean(x, axis=-1, keepdims=True)
    var = jnp.mean((x - mu) ** 2, axis=-1, keepdims=True)   # biased var (torch LayerNorm)
    return (x - mu) * lax.rsqrt(var + LN_EPS) * gamma + beta


def _gelu_new_f32(x):
    c = 0.7978845608028654  # sqrt(2/pi)
    return 0.5 * x * (1.0 + jnp.tanh(c * (x + 0.044715 * x * x * x)))


# ----------------------------------------------------------------------------
# Kernel 1: read_in linear + bias + position embedding (fused)
# ----------------------------------------------------------------------------
def _read_in_kernel(x_ref, w_ref, b_ref, wpe_ref, o_ref):
    x = x_ref[0].astype(jnp.bfloat16)                              # (tt, n_dims)
    y = jnp.dot(x, w_ref[...].astype(jnp.bfloat16),
                preferred_element_type=jnp.float32)                # (tt, E)
    o_ref[0] = (y + b_ref[...] + wpe_ref[...].astype(jnp.float32)).astype(o_ref.dtype)


def read_in_embed(X, w, b, wpe):
    B, T, D = X.shape
    E = w.shape[1]
    tt = _seq_tile(T)
    return pl.pallas_call(
        _read_in_kernel,
        out_shape=jax.ShapeDtypeStruct((B, T, E), jnp.float32),
        grid=(B, T // tt),
        in_specs=[
            pl.BlockSpec((1, tt, D), lambda bi, ti: (bi, ti, 0)),
            pl.BlockSpec((D, E), lambda bi, ti: (0, 0)),
            pl.BlockSpec((1, E), lambda bi, ti: (0, 0)),
            pl.BlockSpec((tt, E), lambda bi, ti: (ti, 0)),
        ],
        out_specs=pl.BlockSpec((1, tt, E), lambda bi, ti: (bi, ti, 0)),
        compiler_params=_cp("parallel", "parallel"),
    )(X, w, b.reshape(1, E), wpe)


# ----------------------------------------------------------------------------
# Kernel 2: generic fused [LayerNorm] -> matmul -> bias -> [gelu] -> [residual]
# ----------------------------------------------------------------------------
def _fused_linear_kernel(*refs, ln, act, residual):
    x_ref, w_ref, b_ref = refs[0], refs[1], refs[2]
    i = 3
    if ln:
        g_ref, be_ref = refs[i], refs[i + 1]
        i += 2
    if residual:
        r_ref = refs[i]
        i += 1
    o_ref = refs[i]

    if ln:
        xf = x_ref[...].astype(jnp.float32)
        xb = _layernorm_f32(xf, g_ref[...], be_ref[...]).astype(jnp.bfloat16)
    else:
        xb = x_ref[...].astype(jnp.bfloat16)

    y = jnp.dot(xb, w_ref[...].astype(jnp.bfloat16),
                preferred_element_type=jnp.float32) + b_ref[...]
    if act == "gelu":
        y = _gelu_new_f32(y)
    if residual:
        y = y + r_ref[...].astype(jnp.float32)
    o_ref[...] = y.astype(o_ref.dtype)


def fused_linear(x, w, b, *, gamma=None, beta=None, residual=None,
                 activation=None, out_dtype=jnp.float32):
    M, K = x.shape
    N = w.shape[1]
    tm = _row_tile(M, K, N)
    tn = _col_tile(N)
    grid = (pl.cdiv(M, tm), pl.cdiv(N, tn))

    in_specs = [
        pl.BlockSpec((tm, K), lambda i, j: (i, 0)),
        pl.BlockSpec((K, tn), lambda i, j: (0, j)),
        pl.BlockSpec((1, tn), lambda i, j: (0, j)),
    ]
    operands = [x, w, b.reshape(1, N)]
    if gamma is not None:
        in_specs += [pl.BlockSpec((1, K), lambda i, j: (0, 0))] * 2
        operands += [gamma.reshape(1, K), beta.reshape(1, K)]
    if residual is not None:
        in_specs.append(pl.BlockSpec((tm, tn), lambda i, j: (i, j)))
        operands.append(residual)

    kernel = functools.partial(_fused_linear_kernel, ln=gamma is not None,
                               act=activation, residual=residual is not None)
    return pl.pallas_call(
        kernel,
        out_shape=jax.ShapeDtypeStruct((M, N), out_dtype),
        grid=grid,
        in_specs=in_specs,
        out_specs=pl.BlockSpec((tm, tn), lambda i, j: (i, j)),
        compiler_params=_cp("parallel", "parallel"),
    )(*operands)


# ----------------------------------------------------------------------------
# Kernel 3: fused LayerNorm + per-head Q/K/V projection (q pre-scaled by 1/sqrt(Dh))
# Writes Q, K, V directly in (B, H, T, Dh) layout -> no JAX-side split_heads transposes.
# ----------------------------------------------------------------------------
def _ln_qkv_kernel(x_ref, g_ref, b_ref, wq_ref, wk_ref, wv_ref,
                   bq_ref, bk_ref, bv_ref, q_ref, k_ref, v_ref, xn_sc, *, scale):
    @pl.when(pl.program_id(2) == 0)            # LayerNorm once per (batch, seq-tile)
    def _():
        x = x_ref[0].astype(jnp.float32)       # (tt, E)
        xn_sc[...] = _layernorm_f32(x, g_ref[...], b_ref[...]).astype(jnp.bfloat16)

    xn = xn_sc[...]                            # (tt, E) bf16

    def proj(w_ref, bias_ref):
        return jnp.dot(xn, w_ref[0].astype(jnp.bfloat16),
                       preferred_element_type=jnp.float32) + bias_ref[0]

    q_ref[0, 0] = (proj(wq_ref, bq_ref) * scale).astype(q_ref.dtype)
    k_ref[0, 0] = proj(wk_ref, bk_ref).astype(k_ref.dtype)
    v_ref[0, 0] = proj(wv_ref, bv_ref).astype(v_ref.dtype)


def ln_qkv(h, blk, n_head):
    B, T, E = h.shape
    H = n_head
    Dh = E // H
    tt = _seq_tile(T)
    scale = 1.0 / float(Dh) ** 0.5

    head_w = pl.BlockSpec((1, E, Dh), lambda bi, ti, hi: (hi, 0, 0))
    head_b = pl.BlockSpec((1, 1, Dh), lambda bi, ti, hi: (hi, 0, 0))
    ln_vec = pl.BlockSpec((1, E), lambda bi, ti, hi: (0, 0))
    out_spec = pl.BlockSpec((1, 1, tt, Dh), lambda bi, ti, hi: (bi, hi, ti, 0))
    out_shape = jax.ShapeDtypeStruct((B, H, T, Dh), jnp.bfloat16)

    return pl.pallas_call(
        functools.partial(_ln_qkv_kernel, scale=scale),
        out_shape=(out_shape,) * 3,
        grid=(B, T // tt, H),
        in_specs=[
            pl.BlockSpec((1, tt, E), lambda bi, ti, hi: (bi, ti, 0)),
            ln_vec, ln_vec,
            head_w, head_w, head_w,
            head_b, head_b, head_b,
        ],
        out_specs=(out_spec,) * 3,
        scratch_shapes=[pltpu.VMEM((tt, E), jnp.bfloat16)],
        compiler_params=_cp("parallel", "parallel", "arbitrary"),
    )(h, blk["ln1_g"].reshape(1, E), blk["ln1_b"].reshape(1, E),
      blk["wq"], blk["wk"], blk["wv"], blk["bq"], blk["bk"], blk["bv"])


# ----------------------------------------------------------------------------
# Kernel 4: causal flash attention (online softmax, causal tile skipping)
# ----------------------------------------------------------------------------
def _flash_attn_kernel(q_ref, k_ref, v_ref, o_ref, m_sc, l_sc, acc_sc, *, tq, tk):
    qi = pl.program_id(2)
    ki = pl.program_id(3)

    @pl.when(ki == 0)
    def _():
        m_sc[...] = jnp.full_like(m_sc, -jnp.inf)
        l_sc[...] = jnp.zeros_like(l_sc)
        acc_sc[...] = jnp.zeros_like(acc_sc)

    # Skip kv tiles that are entirely in the causal-masked (future) region.
    @pl.when(ki * tk <= qi * tq + (tq - 1))
    def _():
        q = q_ref[0, 0]                                    # (tq, Dh) bf16, pre-scaled
        k = k_ref[0, 0]                                    # (tk, Dh) bf16
        s = lax.dot_general(q, k, (((1,), (1,)), ((), ())),
                            preferred_element_type=jnp.float32)   # (tq, tk)
        row = qi * tq + lax.broadcasted_iota(jnp.int32, (tq, tk), 0)
        col = ki * tk + lax.broadcasted_iota(jnp.int32, (tq, tk), 1)
        s = jnp.where(col <= row, s, _MASK_VALUE)

        m_new = jnp.maximum(m_sc[...], jnp.max(s, axis=-1, keepdims=True))
        alpha = jnp.exp(m_sc[...] - m_new)
        p = jnp.exp(s - m_new)
        l_sc[...] = alpha * l_sc[...] + jnp.sum(p, axis=-1, keepdims=True)
        acc_sc[...] = alpha * acc_sc[...] + jnp.dot(
            p.astype(jnp.bfloat16), v_ref[0, 0], preferred_element_type=jnp.float32)
        m_sc[...] = m_new

    @pl.when(ki == pl.num_programs(3) - 1)
    def _():
        inv_l = pl.reciprocal(l_sc[...], approx=True)
        o_ref[0, 0] = (acc_sc[...] * inv_l).astype(o_ref.dtype)


def flash_attention(q, k, v):
    B, H, T, Dh = q.shape
    tq = tk = _seq_tile(T)
    return pl.pallas_call(
        functools.partial(_flash_attn_kernel, tq=tq, tk=tk),
        out_shape=jax.ShapeDtypeStruct((B, H, T, Dh), q.dtype),
        grid=(B, H, T // tq, T // tk),
        in_specs=[
            pl.BlockSpec((1, 1, tq, Dh), lambda bi, hi, qi, ki: (bi, hi, qi, 0)),
            pl.BlockSpec((1, 1, tk, Dh), lambda bi, hi, qi, ki: (bi, hi, ki, 0)),
            pl.BlockSpec((1, 1, tk, Dh), lambda bi, hi, qi, ki: (bi, hi, ki, 0)),
        ],
        out_specs=pl.BlockSpec((1, 1, tq, Dh), lambda bi, hi, qi, ki: (bi, hi, qi, 0)),
        scratch_shapes=[
            pltpu.VMEM((tq, 1), jnp.float32),
            pltpu.VMEM((tq, 1), jnp.float32),
            pltpu.VMEM((tq, Dh), jnp.float32),
        ],
        compiler_params=_cp("parallel", "parallel", "parallel", "arbitrary"),
    )(q, k, v)


# ----------------------------------------------------------------------------
# Kernel 5: attention output projection (head reduction) + bias + residual (fused)
# Consumes (B, H, T, Dh) directly -> no reverse merge_heads transpose.
# ----------------------------------------------------------------------------
def _attn_head_proj_kernel(a_ref, w_ref, b_ref, r_ref, o_ref):
    @pl.when(pl.program_id(2) == 0)
    def _():
        o_ref[...] = (r_ref[...] + b_ref[...]).astype(o_ref.dtype)

    contrib = jnp.dot(a_ref[0, 0].astype(jnp.bfloat16),
                      w_ref[0].astype(jnp.bfloat16),
                      preferred_element_type=jnp.float32)          # (tt, E)
    o_ref[...] += contrib[None].astype(o_ref.dtype)


def attn_head_proj(a, w_heads, bias, residual):
    B, H, T, Dh = a.shape
    E = residual.shape[-1]
    tt = _seq_tile(T)
    return pl.pallas_call(
        _attn_head_proj_kernel,
        out_shape=jax.ShapeDtypeStruct((B, T, E), jnp.float32),
        grid=(B, T // tt, H),
        in_specs=[
            pl.BlockSpec((1, 1, tt, Dh), lambda bi, ti, hi: (bi, hi, ti, 0)),
            pl.BlockSpec((1, Dh, E), lambda bi, ti, hi: (hi, 0, 0)),
            pl.BlockSpec((1, 1, E), lambda bi, ti, hi: (0, 0, 0)),
            pl.BlockSpec((1, tt, E), lambda bi, ti, hi: (bi, ti, 0)),
        ],
        out_specs=pl.BlockSpec((1, tt, E), lambda bi, ti, hi: (bi, ti, 0)),
        compiler_params=_cp("parallel", "parallel", "arbitrary"),
    )(a, w_heads, bias.reshape(1, 1, E), residual)


# ----------------------------------------------------------------------------
# Parameter construction (deterministic, synthetic) + kernel-friendly layout prep
# ----------------------------------------------------------------------------
def init_params(key, n_dims, n_positions, n_embd, n_layer, n_head, n_out):
    std = 0.02
    keys = iter(jax.random.split(key, 4 + 6 * n_layer))

    def nrm(shape):
        return (std * jax.random.normal(next(keys), shape)).astype(jnp.float32)

    params = {
        "read_in_w": nrm((n_dims, n_embd)),
        "read_in_b": jnp.zeros((n_embd,), jnp.float32),
        "wpe": nrm((n_positions, n_embd)),
        "lnf_g": jnp.ones((n_embd,), jnp.float32),
        "lnf_b": jnp.zeros((n_embd,), jnp.float32),
        "read_out_w": nrm((n_embd, n_out)),
        "read_out_b": jnp.zeros((n_out,), jnp.float32),
        "blocks": [],
    }
    for _ in range(n_layer):
        params["blocks"].append({
            "ln1_g": jnp.ones((n_embd,), jnp.float32),
            "ln1_b": jnp.zeros((n_embd,), jnp.float32),
            "attn_w": nrm((n_embd, 3 * n_embd)),      # GPT2 Conv1D: y = x @ W + b
            "attn_b": jnp.zeros((3 * n_embd,), jnp.float32),
            "proj_w": nrm((n_embd, n_embd)),
            "proj_b": jnp.zeros((n_embd,), jnp.float32),
            "ln2_g": jnp.ones((n_embd,), jnp.float32),
            "ln2_b": jnp.zeros((n_embd,), jnp.float32),
            "fc_w": nrm((n_embd, 4 * n_embd)),
            "fc_b": jnp.zeros((4 * n_embd,), jnp.float32),
            "mlp_proj_w": nrm((4 * n_embd, n_embd)),
            "mlp_proj_b": jnp.zeros((n_embd,), jnp.float32),
        })
    return params


def prepare_params(params, n_head):
    """One-time layout prep: per-head QKV/proj weights + bf16 matmul weights."""
    E = params["wpe"].shape[1]
    H = n_head
    Dh = E // H
    bf = jnp.bfloat16
    prep = {
        "read_in_w": params["read_in_w"].astype(bf),
        "read_in_b": params["read_in_b"],
        "wpe": params["wpe"],
        "lnf_g": params["lnf_g"], "lnf_b": params["lnf_b"],
        "read_out_w": params["read_out_w"].astype(bf),
        "read_out_b": params["read_out_b"],
        "blocks": [],
    }
    for blk in params["blocks"]:
        w, b = blk["attn_w"], blk["attn_b"]

        def split(i, w=w, b=b):
            wi = w[:, i * E:(i + 1) * E].reshape(E, H, Dh).transpose(1, 0, 2).astype(bf)
            bi = b[i * E:(i + 1) * E].reshape(H, 1, Dh)
            return wi, bi

        wq, bq = split(0)
        wk, bk = split(1)
        wv, bv = split(2)
        prep["blocks"].append({
            "ln1_g": blk["ln1_g"], "ln1_b": blk["ln1_b"],
            "wq": wq, "wk": wk, "wv": wv, "bq": bq, "bk": bk, "bv": bv,
            "proj_w_heads": blk["proj_w"].reshape(H, Dh, E).astype(bf),
            "proj_b": blk["proj_b"],
            "ln2_g": blk["ln2_g"], "ln2_b": blk["ln2_b"],
            "fc_w": blk["fc_w"].astype(bf), "fc_b": blk["fc_b"],
            "mlp_proj_w": blk["mlp_proj_w"].astype(bf), "mlp_proj_b": blk["mlp_proj_b"],
        })
    return prep


# ----------------------------------------------------------------------------
# Forward pass
# ----------------------------------------------------------------------------
def transformer_forward(X, params, n_head):
    B, T, _ = X.shape
    E = params["wpe"].shape[1]
    rows = B * T

    # read_in + position embeddings (embd_pdrop = 0 -> no dropout)
    h = read_in_embed(X, params["read_in_w"], params["read_in_b"], params["wpe"])

    for blk in params["blocks"]:
        # --- attention sub-block (ln_1 + qkv + flash attn + proj + residual, all fused) ---
        q, k, v = ln_qkv(h, blk, n_head)                    # (B,H,T,Dh) bf16, q pre-scaled
        a = flash_attention(q, k, v)                        # (B,H,T,Dh) bf16
        h = attn_head_proj(a, blk["proj_w_heads"], blk["proj_b"], h)   # (B,T,E) f32

        # --- MLP sub-block (ln_2 + fc + gelu fused; proj + residual fused) ---
        mlp_h = fused_linear(h.reshape(rows, E), blk["fc_w"], blk["fc_b"],
                             gamma=blk["ln2_g"], beta=blk["ln2_b"],
                             activation="gelu", out_dtype=jnp.bfloat16)   # (rows, 4E)
        h = fused_linear(mlp_h, blk["mlp_proj_w"], blk["mlp_proj_b"],
                         residual=h.reshape(rows, E),
                         out_dtype=jnp.float32).reshape(B, T, E)

    # Only the last token is used -> slice before ln_f + read_out (fused).
    h_last = h[:, -1, :]                                     # (B, E)
    pred = fused_linear(h_last, params["read_out_w"], params["read_out_b"],
                        gamma=params["lnf_g"], beta=params["lnf_b"],
                        out_dtype=jnp.float32)               # (B, n_out)
    # TODO(synk): output_attentions / inds arguments of the PyTorch forward are not supported.
    return jnp.squeeze(pred)


# ----------------------------------------------------------------------------
if __name__ == "__main__":
    # small, module-consistent shapes
    n_dims, n_positions, n_embd, n_layer, n_head, n_out = 4, 16, 32, 3, 2, 1
    batch, seq = 2, 8

    key = jax.random.PRNGKey(0)
    k_x, k_p = jax.random.split(key)
    X = jax.random.normal(k_x, (batch, seq, n_dims), dtype=jnp.float32)
    params = init_params(k_p, n_dims, n_positions, n_embd, n_layer, n_head, n_out)
    prep = prepare_params(params, n_head)

    fwd = jax.jit(functools.partial(transformer_forward, n_head=n_head))
    out = fwd(X, prep)
    out = jax.block_until_ready(out)
    assert out.shape == (batch,), out.shape
    print("KERNEL_OK")
</pallas_src>

<mosaic_0001>
module attributes {stable_mosaic.version = 11 : i64} {
  func.func @_read_in_kernel(%arg0: i32, %arg1: i32, %arg2: memref<1x8x4xf32, #tpu.memory_space<vmem>>, %arg3: memref<4x32xbf16, #tpu.memory_space<vmem>>, %arg4: memref<1x32xf32, #tpu.memory_space<vmem>>, %arg5: memref<8x32xf32, #tpu.memory_space<vmem>>, %arg6: memref<1x8x32xf32, #tpu.memory_space<vmem>>) attributes {dimension_semantics = [#tpu.dimension_semantics<parallel>, #tpu.dimension_semantics<parallel>], iteration_bounds = array<i64: 2, 1>, scalar_prefetch = 0 : i64, scratch_operands = 0 : i64, tpu.core_type = #tpu.core_type<tc>, window_params = [{transform_indices = @transform_0, window_bounds = array<i64: 1, 8, 4>}, {pipeline_mode = #tpu.pipeline_mode<synchronous>, transform_indices = @transform_1, window_bounds = array<i64: 4, 32>}, {pipeline_mode = #tpu.pipeline_mode<synchronous>, transform_indices = @transform_2, window_bounds = array<i64: 1, 32>}, {transform_indices = @transform_3, window_bounds = array<i64: 8, 32>}, {transform_indices = @transform_4, window_bounds = array<i64: 1, 8, 32>}]} {
    %c0 = arith.constant 0 : index
    %c0_0 = arith.constant 0 : index
    %c0_1 = arith.constant 0 : index
    %0 = vector.load %arg2[%c0, %c0_0, %c0_1] : memref<1x8x4xf32, #tpu.memory_space<vmem>>, vector<1x8x4xf32>
    %1 = vector.shape_cast %0 : vector<1x8x4xf32> to vector<8x4xf32>
    %2 = arith.truncf %1 : vector<8x4xf32> to vector<8x4xbf16>
    %c0_2 = arith.constant 0 : index
    %c0_3 = arith.constant 0 : index
    %3 = vector.load %arg3[%c0_2, %c0_3] : memref<4x32xbf16, #tpu.memory_space<vmem>>, vector<4x32xbf16>
    %cst = arith.constant dense<0.000000e+00> : vector<8x32xf32>
    %4 = tpu.matmul %2, %3, %cst {dimension_numbers = #tpu.dot_dimension_numbers<[1], [0], [0], [1], [0, 0, 1, 1], [], []>} : vector<8x4xbf16>, vector<4x32xbf16>, vector<8x32xf32> -> vector<8x32xf32>
    %c0_4 = arith.constant 0 : index
    %c0_5 = arith.constant 0 : index
    %5 = vector.load %arg4[%c0_4, %c0_5] : memref<1x32xf32, #tpu.memory_space<vmem>>, vector<1x32xf32>
    %6 = vector.broadcast %5 : vector<1x32xf32> to vector<8x32xf32>
    %7 = arith.addf %4, %6 : vector<8x32xf32>
    %c0_6 = arith.constant 0 : index
    %c0_7 = arith.constant 0 : index
    %8 = vector.load %arg5[%c0_6, %c0_7] : memref<8x32xf32, #tpu.memory_space<vmem>>, vector<8x32xf32>
    %9 = arith.addf %7, %8 : vector<8x32xf32>
    %c0_8 = arith.constant 0 : index
    %c0_9 = arith.constant 0 : index
    %c0_10 = arith.constant 0 : index
    %10 = vector.load %arg6[%c0_8, %c0_9, %c0_10] : memref<1x8x32xf32, #tpu.memory_space<vmem>>, vector<1x8x32xf32>
    %11 = vector.shape_cast %10 : vector<1x8x32xf32> to vector<8x32xf32>
    %12 = vector.shape_cast %9 : vector<8x32xf32> to vector<1x8x32xf32>
    tpu.vector_store %arg6[%c0_8, %c0_9, %c0_10], %12 {strides = array<i32>} : memref<1x8x32xf32, #tpu.memory_space<vmem>>, vector<1x8x32xf32>,
    return
  }
  func.func @transform_0(%arg0: i32, %arg1: i32) -> (i32, i32, i32) {
    %c0_i32 = arith.constant 0 : i32
    %c0_i32_0 = arith.constant 0 : i32
    return %arg0, %arg1, %c0_i32 : i32, i32, i32
  }
  func.func @transform_1(%arg0: i32, %arg1: i32) -> (i32, i32) {
    %c0_i32 = arith.constant 0 : i32
    %c0_i32_0 = arith.constant 0 : i32
    %c0_i32_1 = arith.constant 0 : i32
    return %c0_i32, %c0_i32_0 : i32, i32
  }
  func.func @transform_2(%arg0: i32, %arg1: i32) -> (i32, i32) {
    %c0_i32 = arith.constant 0 : i32
    %c0_i32_0 = arith.constant 0 : i32
    %c0_i32_1 = arith.constant 0 : i32
    return %c0_i32, %c0_i32_0 : i32, i32
  }
  func.func @transform_3(%arg0: i32, %arg1: i32) -> (i32, i32) {
    %c0_i32 = arith.constant 0 : i32
    %c0_i32_0 = arith.constant 0 : i32
    return %arg1, %c0_i32 : i32, i32
  }
  func.func @transform_4(%arg0: i32, %arg1: i32) -> (i32, i32, i32) {
    %c0_i32 = arith.constant 0 : i32
    %c0_i32_0 = arith.constant 0 : i32
    return %arg0, %arg1, %c0_i32 : i32, i32, i32
  }
}

module attributes {stable_mosaic.version = 11 : i64} {
  func.func @_ln_qkv_kernel(%arg0: i32, %arg1: i32, %arg2: i32, %arg3: memref<1x8x32xf32, #tpu.memory_space<vmem>>, %arg4: memref<1x32xf32, #tpu.memory_space<vmem>>, %arg5: memref<1x32xf32, #tpu.memory_space<vmem>>, %arg6: memref<1x32x16xbf16, #tpu.memory_space<vmem>>, %arg7: memref<1x32x16xbf16, #tpu.memory_space<vmem>>, %arg8: memref<1x32x16xbf16, #tpu.memory_space<vmem>>, %arg9: memref<1x1x16xf32, #tpu.memory_space<vmem>>, %arg10: memref<1x1x16xf32, #tpu.memory_space<vmem>>, %arg11: memref<1x1x16xf32, #tpu.memory_space<vmem>>, %arg12: memref<1x1x8x16xbf16, #tpu.memory_space<vmem>>, %arg13: memref<1x1x8x16xbf16, #tpu.memory_space<vmem>>, %arg14: memref<1x1x8x16xbf16, #tpu.memory_space<vmem>>, %arg15: memref<8x32xbf16, #tpu.memory_space<vmem>>) attributes {dimension_semantics = [#tpu.dimension_semantics<parallel>, #tpu.dimension_semantics<parallel>, #tpu.dimension_semantics<arbitrary>], iteration_bounds = array<i64: 2, 1, 2>, scalar_prefetch = 0 : i64, scratch_operands = 1 : i64, tpu.core_type = #tpu.core_type<tc>, window_params = [{transform_indices = @transform_0, window_bounds = array<i64: 1, 8, 32>}, {pipeline_mode = #tpu.pipeline_mode<synchronous>, transform_indices = @transform_1, window_bounds = array<i64: 1, 32>}, {pipeline_mode = #tpu.pipeline_mode<synchronous>, transform_indices = @transform_2, window_bounds = array<i64: 1, 32>}, {transform_indices = @transform_3, window_bounds = array<i64: 1, 32, 16>}, {transform_indices = @transform_4, window_bounds = array<i64: 1, 32, 16>}, {transform_indices = @transform_5, window_bounds = array<i64: 1, 32, 16>}, {transform_indices = @transform_6, window_bounds = array<i64: 1, 1, 16>}, {transform_indices = @transform_7, window_bounds = array<i64: 1, 1, 16>}, {transform_indices = @transform_8, window_bounds = array<i64: 1, 1, 16>}, {transform_indices = @transform_9, window_bounds = array<i64: 1, 1, 8, 16>}, {transform_indices = @transform_10, window_bounds = array<i64: 1, 1, 8, 16>}, {transform_indices = @transform_11, window_bounds = array<i64: 1, 1, 8, 16>}]} {
    %c0_i32 = arith.constant 0 : i32
    %0 = arith.cmpi eq, %arg2, %c0_i32 : i32
    %1 = arith.extui %0 : i1 to i32
    %c0_i32_0 = arith.constant 0 : i32
    %2 = arith.cmpi ne, %1, %c0_i32_0 : i32
    scf.if %2 {
      %c0_35 = arith.constant 0 : index
      %c0_36 = arith.constant 0 : index
      %c0_37 = arith.constant 0 : index
      %39 = vector.load %arg3[%c0_35, %c0_36, %c0_37] : memref<1x8x32xf32, #tpu.memory_space<vmem>>, vector<1x8x32xf32>
      %40 = vector.shape_cast %39 : vector<1x8x32xf32> to vector<8x32xf32>
      %c0_38 = arith.constant 0 : index
      %c0_39 = arith.constant 0 : index
      %41 = vector.load %arg4[%c0_38, %c0_39] : memref<1x32xf32, #tpu.memory_space<vmem>>, vector<1x32xf32>
      %c0_40 = arith.constant 0 : index
      %c0_41 = arith.constant 0 : index
      %42 = vector.load %arg5[%c0_40, %c0_41] : memref<1x32xf32, #tpu.memory_space<vmem>>, vector<1x32xf32>
      %cst_42 = arith.constant dense<0.000000e+00> : vector<8xf32>
      %43 = vector.multi_reduction <add>, %40, %cst_42 [1] : vector<8x32xf32> to vector<8xf32>
      %44 = vector.shape_cast %43 : vector<8xf32> to vector<8x1xf32>
      %cst_43 = arith.constant 3.200000e+01 : f32
      %45 = vector.broadcast %cst_43 : f32 to vector<8x1xf32>
      %46 = arith.divf %44, %45 : vector<8x1xf32>
      %47 = vector.broadcast %46 : vector<8x1xf32> to vector<8x32xf32>
      %48 = arith.subf %40, %47 : vector<8x32xf32>
      %49 = arith.mulf %48, %48 : vector<8x32xf32>
      %cst_44 = arith.constant dense<0.000000e+00> : vector<8xf32>
      %50 = vector.multi_reduction <add>, %49, %cst_44 [1] : vector<8x32xf32> to vector<8xf32>
      %51 = vector.shape_cast %50 : vector<8xf32> to vector<8x1xf32>
      %cst_45 = arith.constant 3.200000e+01 : f32
      %52 = vector.broadcast %cst_45 : f32 to vector<8x1xf32>
      %53 = arith.divf %51, %52 : vector<8x1xf32>
      %54 = vector.broadcast %46 : vector<8x1xf32> to vector<8x32xf32>
      %55 = arith.subf %40, %54 : vector<8x32xf32>
      %cst_46 = arith.constant 9.99999974E-6 : f32
      %56 = vector.broadcast %cst_46 : f32 to vector<8x1xf32>
      %57 = arith.addf %53, %56 : vector<8x1xf32>
      %58 = math.rsqrt %57 : vector<8x1xf32>
      %59 = vector.broadcast %58 : vector<8x1xf32> to vector<8x32xf32>
      %60 = arith.mulf %55, %59 : vector<8x32xf32>
      %61 = vector.broadcast %41 : vector<1x32xf32> to vector<8x32xf32>
      %62 = arith.mulf %60, %61 : vector<8x32xf32>
      %63 = vector.broadcast %42 : vector<1x32xf32> to vector<8x32xf32>
      %64 = arith.addf %62, %63 : vector<8x32xf32>
      %65 = arith.truncf %64 : vector<8x32xf32> to vector<8x32xbf16>
      %c0_47 = arith.constant 0 : index
      %c0_48 = arith.constant 0 : index
      %66 = vector.load %arg15[%c0_47, %c0_48] : memref<8x32xbf16, #tpu.memory_space<vmem>>, vector<8x32xbf16>
      tpu.vector_store %arg15[%c0_47, %c0_48], %65 {strides = array<i32>} : memref<8x32xbf16, #tpu.memory_space<vmem>>, vector<8x32xbf16>,
    } else {
    }
    %c0 = arith.constant 0 : index
    %c0_1 = arith.constant 0 : index
    %3 = vector.load %arg15[%c0, %c0_1] : memref<8x32xbf16, #tpu.memory_space<vmem>>, vector<8x32xbf16>
    %c0_2 = arith.constant 0 : index
    %c0_3 = arith.constant 0 : index
    %c0_4 = arith.constant 0 : index
    %4 = vector.load %arg6[%c0_2, %c0_3, %c0_4] : memref<1x32x16xbf16, #tpu.memory_space<vmem>>, vector<1x32x16xbf16>
    %5 = vector.shape_cast %4 : vector<1x32x16xbf16> to vector<32x16xbf16>
    %cst = arith.constant dense<0.000000e+00> : vector<8x16xf32>
    %6 = tpu.matmul %3, %5, %cst {dimension_numbers = #tpu.dot_dimension_numbers<[1], [0], [0], [1], [0, 0, 1, 1], [], []>} : vector<8x32xbf16>, vector<32x16xbf16>, vector<8x16xf32> -> vector<8x16xf32>
    %c0_5 = arith.constant 0 : index
    %c0_6 = arith.constant 0 : index
    %c0_7 = arith.constant 0 : index
    %7 = vector.load %arg9[%c0_5, %c0_6, %c0_7] : memref<1x1x16xf32, #tpu.memory_space<vmem>>, vector<1x1x16xf32>
    %8 = vector.shape_cast %7 : vector<1x1x16xf32> to vector<1x16xf32>
    %9 = vector.broadcast %8 : vector<1x16xf32> to vector<8x16xf32>
    %10 = arith.addf %6, %9 : vector<8x16xf32>
    %cst_8 = arith.constant 2.500000e-01 : f32
    %11 = vector.broadcast %cst_8 : f32 to vector<8x16xf32>
    %12 = arith.mulf %10, %11 : vector<8x16xf32>
    %13 = arith.truncf %12 : vector<8x16xf32> to vector<8x16xbf16>
    %c0_9 = arith.constant 0 : index
    %c0_10 = arith.constant 0 : index
    %c0_11 = arith.constant 0 : index
    %c0_12 = arith.constant 0 : index
    %14 = vector.load %arg12[%c0_9, %c0_10, %c0_11, %c0_12] : memref<1x1x8x16xbf16, #tpu.memory_space<vmem>>, vector<1x1x8x16xbf16>
    %15 = vector.shape_cast %14 : vector<1x1x8x16xbf16> to vector<8x16xbf16>
    %16 = vector.shape_cast %13 : vector<8x16xbf16> to vector<1x1x8x16xbf16>
    tpu.vector_store %arg12[%c0_9, %c0_10, %c0_11, %c0_12], %16 {strides = array<i32>} : memref<1x1x8x16xbf16, #tpu.memory_space<vmem>>, vector<1x1x8x16xbf16>,
    %c0_13 = arith.constant 0 : index
    %c0_14 = arith.constant 0 : index
    %c0_15 = arith.constant 0 : index
    %17 = vector.load %arg7[%c0_13, %c0_14, %c0_15] : memref<1x32x16xbf16, #tpu.memory_space<vmem>>, vector<1x32x16xbf16>
    %18 = vector.shape_cast %17 : vector<1x32x16xbf16> to vector<32x16xbf16>
    %cst_16 = arith.constant dense<0.000000e+00> : vector<8x16xf32>
    %19 = tpu.matmul %3, %18, %cst_16 {dimension_numbers = #tpu.dot_dimension_numbers<[1], [0], [0], [1], [0, 0, 1, 1], [], []>} : vector<8x32xbf16>, vector<32x16xbf16>, vector<8x16xf32> -> vector<8x16xf32>
    %c0_17 = arith.constant 0 : index
    %c0_18 = arith.constant 0 : index
    %c0_19 = arith.constant 0 : index
    %20 = vector.load %arg10[%c0_17, %c0_18, %c0_19] : memref<1x1x16xf32, #tpu.memory_space<vmem>>, vector<1x1x16xf32>
    %21 = vector.shape_cast %20 : vector<1x1x16xf32> to vector<1x16xf32>
    %22 = vector.broadcast %21 : vector<1x16xf32> to vector<8x16xf32>
    %23 = arith.addf %19, %22 : vector<8x16xf32>
    %24 = arith.truncf %23 : vector<8x16xf32> to vector<8x16xbf16>
    %c0_20 = arith.constant 0 : index
    %c0_21 = arith.constant 0 : index
    %c0_22 = arith.constant 0 : index
    %c0_23 = arith.constant 0 : index
    %25 = vector.load %arg13[%c0_20, %c0_21, %c0_22, %c0_23] : memref<1x1x8x16xbf16, #tpu.memory_space<vmem>>, vector<1x1x8x16xbf16>
    %26 = vector.shape_cast %25 : vector<1x1x8x16xbf16> to vector<8x16xbf16>
    %27 = vector.shape_cast %24 : vector<8x16xbf16> to vector<1x1x8x16xbf16>
    tpu.vector_store %arg13[%c0_20, %c0_21, %c0_22, %c0_23], %27 {strides = array<i32>} : memref<1x1x8x16xbf16, #tpu.memory_space<vmem>>, vector<1x1x8x16xbf16>,
    %c0_24 = arith.constant 0 : index
    %c0_25 = arith.constant 0 : index
    %c0_26 = arith.constant 0 : index
    %28 = vector.load %arg8[%c0_24, %c0_25, %c0_26] : memref<1x32x16xbf16, #tpu.memory_space<vmem>>, vector<1x32x16xbf16>
    %29 = vector.shape_cast %28 : vector<1x32x16xbf16> to vector<32x16xbf16>
    %cst_27 = arith.constant dense<0.000000e+00> : vector<8x16xf32>
    %30 = tpu.matmul %3, %29, %cst_27 {dimension_numbers = #tpu.dot_dimension_numbers<[1], [0], [0], [1], [0, 0, 1, 1], [], []>} : vector<8x32xbf16>, vector<32x16xbf16>, vector<8x16xf32> -> vector<8x16xf32>
    %c0_28 = arith.constant 0 : index
    %c0_29 = arith.constant 0 : index
    %c0_30 = arith.constant 0 : index
    %31 = vector.load %arg11[%c0_28, %c0_29, %c0_30] : memref<1x1x16xf32, #tpu.memory_space<vmem>>, vector<1x1x16xf32>
    %32 = vector.shape_cast %31 : vector<1x1x16xf32> to vector<1x16xf32>
    %33 = vector.broadcast %32 : vector<1x16xf32> to vector<8x16xf32>
    %34 = arith.addf %30, %33 : vector<8x16xf32>
    %35 = arith.truncf %34 : vector<8x16xf32> to vector<8x16xbf16>
    %c0_31 = arith.constant 0 : index
    %c0_32 = arith.constant 0 : index
    %c0_33 = arith.constant 0 : index
    %c0_34 = arith.constant 0 : index
    %36 = vector.load %arg14[%c0_31, %c0_32, %c0_33, %c0_34] : memref<1x1x8x16xbf16, #tpu.memory_space<vmem>>, vector<1x1x8x16xbf16>
    %37 = vector.shape_cast %36 : vector<1x1x8x16xbf16> to vector<8x16xbf16>
    %38 = vector.shape_cast %35 : vector<8x16xbf16> to vector<1x1x8x16xbf16>
    tpu.vector_store %arg14[%c0_31, %c0_32, %c0_33, %c0_34], %38 {strides = array<i32>} : memref<1x1x8x16xbf16, #tpu.memory_space<vmem>>, vector<1x1x8x16xbf16>,
    return
  }
  func.func @transform_0(%arg0: i32, %arg1: i32, %arg2: i32) -> (i32, i32, i32) {
    %c0_i32 = arith.constant 0 : i32
    %c0_i32_0 = arith.constant 0 : i32
    return %arg0, %arg1, %c0_i32 : i32, i32, i32
  }
  func.func @transform_1(%arg0: i32, %arg1: i32, %arg2: i32) -> (i32, i32) {
    %c0_i32 = arith.constant 0 : i32
    %c0_i32_0 = arith.constant 0 : i32
    %c0_i32_1 = arith.constant 0 : i32
    return %c0_i32, %c0_i32_0 : i32, i32
  }
  func.func @transform_2(%arg0: i32, %arg1: i32, %arg2: i32) -> (i32, i32) {
    %c0_i32 = arith.constant 0 : i32
    %c0_i32_0 = arith.constant 0 : i32
    %c0_i32_1 = arith.constant 0 : i32
    return %c0_i32, %c0_i32_0 : i32, i32
  }
  func.func @transform_3(%arg0: i32, %arg1: i32, %arg2: i32) -> (i32, i32, i32) {
    %c0_i32 = arith.constant 0 : i32
    %c0_i32_0 = arith.constant 0 : i32
    %c0_i32_1 = arith.constant 0 : i32
    return %arg2, %c0_i32, %c0_i32_0 : i32, i32, i32
  }
  func.func @transform_4(%arg0: i32, %arg1: i32, %arg2: i32) -> (i32, i32, i32) {
    %c0_i32 = arith.constant 0 : i32
    %c0_i32_0 = arith.constant 0 : i32
    %c0_i32_1 = arith.constant 0 : i32
    return %arg2, %c0_i32, %c0_i32_0 : i32, i32, i32
  }
  func.func @transform_5(%arg0: i32, %arg1: i32, %arg2: i32) -> (i32, i32, i32) {
    %c0_i32 = arith.constant 0 : i32
    %c0_i32_0 = arith.constant 0 : i32
    %c0_i32_1 = arith.constant 0 : i32
    return %arg2, %c0_i32, %c0_i32_0 : i32, i32, i32
  }
  func.func @transform_6(%arg0: i32, %arg1: i32, %arg2: i32) -> (i32, i32, i32) {
    %c0_i32 = arith.constant 0 : i32
    %c0_i32_0 = arith.constant 0 : i32
    %c0_i32_1 = arith.constant 0 : i32
    return %arg2, %c0_i32, %c0_i32_0 : i32, i32, i32
  }
  func.func @transform_7(%arg0: i32, %arg1: i32, %arg2: i32) -> (i32, i32, i32) {
    %c0_i32 = arith.constant 0 : i32
    %c0_i32_0 = arith.constant 0 : i32
    %c0_i32_1 = arith.constant 0 : i32
    return %arg2, %c0_i32, %c0_i32_0 : i32, i32, i32
  }
  func.func @transform_8(%arg0: i32, %arg1: i32, %arg2: i32) -> (i32, i32, i32) {
    %c0_i32 = arith.constant 0 : i32
    %c0_i32_0 = arith.constant 0 : i32
    %c0_i32_1 = arith.constant 0 : i32
    return %arg2, %c0_i32, %c0_i32_0 : i32, i32, i32
  }
  func.func @transform_9(%arg0: i32, %arg1: i32, %arg2: i32) -> (i32, i32, i32, i32) {
    %c0_i32 = arith.constant 0 : i32
    %c0_i32_0 = arith.constant 0 : i32
    return %arg0, %arg2, %arg1, %c0_i32 : i32, i32, i32, i32
  }
  func.func @transform_10(%arg0: i32, %arg1: i32, %arg2: i32) -> (i32, i32, i32, i32) {
    %c0_i32 = arith.constant 0 : i32
    %c0_i32_0 = arith.constant 0 : i32
    return %arg0, %arg2, %arg1, %c0_i32 : i32, i32, i32, i32
  }
  func.func @transform_11(%arg0: i32, %arg1: i32, %arg2: i32) -> (i32, i32, i32, i32) {
    %c0_i32 = arith.constant 0 : i32
    %c0_i32_0 = arith.constant 0 : i32
    return %arg0, %arg2, %arg1, %c0_i32 : i32, i32, i32, i32
  }
}

module attributes {stable_mosaic.version = 11 : i64} {
  func.func @_attn_head_proj_kernel(%arg0: i32, %arg1: i32, %arg2: i32, %arg3: memref<1x1x8x16xbf16, #tpu.memory_space<vmem>>, %arg4: memref<1x16x32xbf16, #tpu.memory_space<vmem>>, %arg5: memref<1x1x32xf32, #tpu.memory_space<vmem>>, %arg6: memref<1x8x32xf32, #tpu.memory_space<vmem>>, %arg7: memref<1x8x32xf32, #tpu.memory_space<vmem>>) attributes {dimension_semantics = [#tpu.dimension_semantics<parallel>, #tpu.dimension_semantics<parallel>, #tpu.dimension_semantics<arbitrary>], iteration_bounds = array<i64: 2, 1, 2>, scalar_prefetch = 0 : i64, scratch_operands = 0 : i64, tpu.core_type = #tpu.core_type<tc>, window_params = [{transform_indices = @transform_0, window_bounds = array<i64: 1, 1, 8, 16>}, {transform_indices = @transform_1, window_bounds = array<i64: 1, 16, 32>}, {pipeline_mode = #tpu.pipeline_mode<synchronous>, transform_indices = @transform_2, window_bounds = array<i64: 1, 1, 32>}, {transform_indices = @transform_3, window_bounds = array<i64: 1, 8, 32>}, {transform_indices = @transform_4, window_bounds = array<i64: 1, 8, 32>}]} {
    %c0_i32 = arith.constant 0 : i32
    %0 = arith.cmpi eq, %arg2, %c0_i32 : i32
    %1 = arith.extui %0 : i1 to i32
    %c0_i32_0 = arith.constant 0 : i32
    %2 = arith.cmpi ne, %1, %c0_i32_0 : i32
    scf.if %2 {
      %c0_13 = arith.constant 0 : index
      %c0_14 = arith.constant 0 : index
      %c0_15 = arith.constant 0 : index
      %12 = vector.load %arg6[%c0_13, %c0_14, %c0_15] : memref<1x8x32xf32, #tpu.memory_space<vmem>>, vector<1x8x32xf32>
      %c0_16 = arith.constant 0 : index
      %c0_17 = arith.constant 0 : index
      %c0_18 = arith.constant 0 : index
      %13 = vector.load %arg5[%c0_16, %c0_17, %c0_18] : memref<1x1x32xf32, #tpu.memory_space<vmem>>, vector<1x1x32xf32>
      %14 = vector.broadcast %13 : vector<1x1x32xf32> to vector<1x8x32xf32>
      %15 = arith.addf %12, %14 : vector<1x8x32xf32>
      %c0_19 = arith.constant 0 : index
      %c0_20 = arith.constant 0 : index
      %c0_21 = arith.constant 0 : index
      %16 = vector.load %arg7[%c0_19, %c0_20, %c0_21] : memref<1x8x32xf32, #tpu.memory_space<vmem>>, vector<1x8x32xf32>
      tpu.vector_store %arg7[%c0_19, %c0_20, %c0_21], %15 {strides = array<i32>} : memref<1x8x32xf32, #tpu.memory_space<vmem>>, vector<1x8x32xf32>,
    } else {
    }
    %c0 = arith.constant 0 : index
    %c0_1 = arith.constant 0 : index
    %c0_2 = arith.constant 0 : index
    %c0_3 = arith.constant 0 : index
    %3 = vector.load %arg3[%c0, %c0_1, %c0_2, %c0_3] : memref<1x1x8x16xbf16, #tpu.memory_space<vmem>>, vector<1x1x8x16xbf16>
    %4 = vector.shape_cast %3 : vector<1x1x8x16xbf16> to vector<8x16xbf16>
    %c0_4 = arith.constant 0 : index
    %c0_5 = arith.constant 0 : index
    %c0_6 = arith.constant 0 : index
    %5 = vector.load %arg4[%c0_4, %c0_5, %c0_6] : memref<1x16x32xbf16, #tpu.memory_space<vmem>>, vector<1x16x32xbf16>
    %6 = vector.shape_cast %5 : vector<1x16x32xbf16> to vector<16x32xbf16>
    %cst = arith.constant dense<0.000000e+00> : vector<8x32xf32>
    %7 = tpu.matmul %4, %6, %cst {dimension_numbers = #tpu.dot_dimension_numbers<[1], [0], [0], [1], [0, 0, 1, 1], [], []>} : vector<8x16xbf16>, vector<16x32xbf16>, vector<8x32xf32> -> vector<8x32xf32>
    %c0_7 = arith.constant 0 : index
    %c0_8 = arith.constant 0 : index
    %c0_9 = arith.constant 0 : index
    %8 = vector.load %arg7[%c0_7, %c0_8, %c0_9] : memref<1x8x32xf32, #tpu.memory_space<vmem>>, vector<1x8x32xf32>
    %9 = vector.shape_cast %7 : vector<8x32xf32> to vector<1x8x32xf32>
    %10 = arith.addf %8, %9 : vector<1x8x32xf32>
    %c0_10 = arith.constant 0 : index
    %c0_11 = arith.constant 0 : index
    %c0_12 = arith.constant 0 : index
    %11 = vector.load %arg7[%c0_10, %c0_11, %c0_12] : memref<1x8x32xf32, #tpu.memory_space<vmem>>, vector<1x8x32xf32>
    tpu.vector_store %arg7[%c0_10, %c0_11, %c0_12], %10 {strides = array<i32>} : memref<1x8x32xf32, #tpu.memory_space<vmem>>, vector<1x8x32xf32>,
    return
  }
  func.func @transform_0(%arg0: i32, %arg1: i32, %arg2: i32) -> (i32, i32, i32, i32) {
    %c0_i32 = arith.constant 0 : i32
    %c0_i32_0 = arith.constant 0 : i32
    return %arg0, %arg2, %arg1, %c0_i32 : i32, i32, i32, i32
  }
  func.func @transform_1(%arg0: i32, %arg1: i32, %arg2: i32) -> (i32, i32, i32) {
    %c0_i32 = arith.constant 0 : i32
    %c0_i32_0 = arith.constant 0 : i32
    %c0_i32_1 = arith.constant 0 : i32
    return %arg2, %c0_i32, %c0_i32_0 : i32, i32, i32
  }
  func.func @transform_2(%arg0: i32, %arg1: i32, %arg2: i32) -> (i32, i32, i32) {
    %c0_i32 = arith.constant 0 : i32
    %c0_i32_0 = arith.constant 0 : i32
    %c0_i32_1 = arith.constant 0 : i32
    %c0_i32_2 = arith.constant 0 : i32
    return %c0_i32, %c0_i32_0, %c0_i32_1 : i32, i32, i32
  }
  func.func @transform_3(%arg0: i32, %arg1: i32, %arg2: i32) -> (i32, i32, i32) {
    %c0_i32 = arith.constant 0 : i32
    %c0_i32_0 = arith.constant 0 : i32
    return %arg0, %arg1, %c0_i32 : i32, i32, i32
  }
  func.func @transform_4(%arg0: i32, %arg1: i32, %arg2: i32) -> (i32, i32, i32) {
    %c0_i32 = arith.constant 0 : i32
    %c0_i32_0 = arith.constant 0 : i32
    return %arg0, %arg1, %c0_i32 : i32, i32, i32
  }
}

module attributes {stable_mosaic.version = 11 : i64} {
  func.func @_flash_attn_kernel(%arg0: i32, %arg1: i32, %arg2: i32, %arg3: i32, %arg4: memref<1x1x8x16xbf16, #tpu.memory_space<vmem>>, %arg5: memref<1x1x8x16xbf16, #tpu.memory_space<vmem>>, %arg6: memref<1x1x8x16xbf16, #tpu.memory_space<vmem>>, %arg7: memref<1x1x8x16xbf16, #tpu.memory_space<vmem>>, %arg8: memref<8x1xf32, #tpu.memory_space<vmem>>, %arg9: memref<8x1xf32, #tpu.memory_space<vmem>>, %arg10: memref<8x16xf32, #tpu.memory_space<vmem>>) attributes {dimension_semantics = [#tpu.dimension_semantics<parallel>, #tpu.dimension_semantics<parallel>, #tpu.dimension_semantics<parallel>, #tpu.dimension_semantics<arbitrary>], iteration_bounds = array<i64: 2, 2, 1, 1>, scalar_prefetch = 0 : i64, scratch_operands = 3 : i64, tpu.core_type = #tpu.core_type<tc>, window_params = [{transform_indices = @transform_0, window_bounds = array<i64: 1, 1, 8, 16>}, {transform_indices = @transform_1, window_bounds = array<i64: 1, 1, 8, 16>}, {transform_indices = @transform_2, window_bounds = array<i64: 1, 1, 8, 16>}, {transform_indices = @transform_3, window_bounds = array<i64: 1, 1, 8, 16>}]} {
    %c0_i32 = arith.constant 0 : i32
    %0 = arith.cmpi eq, %arg3, %c0_i32 : i32
    %1 = arith.extui %0 : i1 to i32
    %c0_i32_0 = arith.constant 0 : i32
    %2 = arith.cmpi ne, %1, %c0_i32_0 : i32
    scf.if %2 {
      %cst = arith.constant 0xFF800000 : f32
      %12 = vector.broadcast %cst : f32 to vector<8x1xf32>
      %c0 = arith.constant 0 : index
      %c0_5 = arith.constant 0 : index
      %13 = vector.load %arg8[%c0, %c0_5] : memref<8x1xf32, #tpu.memory_space<vmem>>, vector<8x1xf32>
      tpu.vector_store %arg8[%c0, %c0_5], %12 {strides = array<i32>} : memref<8x1xf32, #tpu.memory_space<vmem>>, vector<8x1xf32>,
      %cst_6 = arith.constant 0.000000e+00 : f32
      %14 = vector.broadcast %cst_6 : f32 to vector<8x1xf32>
      %c0_7 = arith.constant 0 : index
      %c0_8 = arith.constant 0 : index
      %15 = vector.load %arg9[%c0_7, %c0_8] : memref<8x1xf32, #tpu.memory_space<vmem>>, vector<8x1xf32>
      tpu.vector_store %arg9[%c0_7, %c0_8], %14 {strides = array<i32>} : memref<8x1xf32, #tpu.memory_space<vmem>>, vector<8x1xf32>,
      %cst_9 = arith.constant 0.000000e+00 : f32
      %16 = vector.broadcast %cst_9 : f32 to vector<8x16xf32>
      %c0_10 = arith.constant 0 : index
      %c0_11 = arith.constant 0 : index
      %17 = vector.load %arg10[%c0_10, %c0_11] : memref<8x16xf32, #tpu.memory_space<vmem>>, vector<8x16xf32>
      tpu.vector_store %arg10[%c0_10, %c0_11], %16 {strides = array<i32>} : memref<8x16xf32, #tpu.memory_space<vmem>>, vector<8x16xf32>,
    } else {
    }
    %c8_i32 = arith.constant 8 : i32
    %3 = arith.muli %arg3, %c8_i32 : i32
    %c8_i32_1 = arith.constant 8 : i32
    %4 = arith.muli %arg2, %c8_i32_1 : i32
    %c7_i32 = arith.constant 7 : i32
    %5 = arith.addi %4, %c7_i32 : i32
    %6 = arith.cmpi sle, %3, %5 : i32
    %7 = arith.extui %6 : i1 to i32
    %c0_i32_2 = arith.constant 0 : i32
    %8 = arith.cmpi ne, %7, %c0_i32_2 : i32
    scf.if %8 {
      %c0 = arith.constant 0 : index
      %c0_5 = arith.constant 0 : index
      %c0_6 = arith.constant 0 : index
      %c0_7 = arith.constant 0 : index
      %12 = vector.load %arg4[%c0, %c0_5, %c0_6, %c0_7] : memref<1x1x8x16xbf16, #tpu.memory_space<vmem>>, vector<1x1x8x16xbf16>
      %13 = vector.shape_cast %12 : vector<1x1x8x16xbf16> to vector<8x16xbf16>
      %c0_8 = arith.constant 0 : index
      %c0_9 = arith.constant 0 : index
      %c0_10 = arith.constant 0 : index
      %c0_11 = arith.constant 0 : index
      %14 = vector.load %arg5[%c0_8, %c0_9, %c0_10, %c0_11] : memref<1x1x8x16xbf16, #tpu.memory_space<vmem>>, vector<1x1x8x16xbf16>
      %15 = vector.shape_cast %14 : vector<1x1x8x16xbf16> to vector<8x16xbf16>
      %cst = arith.constant dense<0.000000e+00> : vector<8x8xf32>
      %16 = tpu.matmul %13, %15, %cst {dimension_numbers = #tpu.dot_dimension_numbers<[1], [1], [0], [0], [0, 0, 1, 0], [], []>} : vector<8x16xbf16>, vector<8x16xbf16>, vector<8x8xf32> -> vector<8x8xf32>
      %c8_i32_12 = arith.constant 8 : i32
      %17 = arith.muli %arg2, %c8_i32_12 : i32
      %18 = tpu.iota {dimensions = array<i32: 0>} : vector<8x8xi32>
      %19 = vector.broadcast %17 : i32 to vector<8x8xi32>
      %20 = arith.addi %19, %18 : vector<8x8xi32>
      %c8_i32_13 = arith.constant 8 : i32
      %21 = arith.muli %arg3, %c8_i32_13 : i32
      %22 = tpu.iota {dimensions = array<i32: 1>} : vector<8x8xi32>
      %23 = vector.broadcast %21 : i32 to vector<8x8xi32>
      %24 = arith.addi %23, %22 : vector<8x8xi32>
      %25 = arith.cmpi sle, %24, %20 : vector<8x8xi32>
      %cst_14 = arith.constant -1.000000e+30 : f32
      %26 = vector.broadcast %cst_14 : f32 to vector<8x8xf32>
      %27 = arith.select %25, %16, %26 : vector<8x8xi1>, vector<8x8xf32>
      %c0_15 = arith.constant 0 : index
      %c0_16 = arith.constant 0 : index
      %28 = vector.load %arg8[%c0_15, %c0_16] : memref<8x1xf32, #tpu.memory_space<vmem>>, vector<8x1xf32>
      %cst_17 = arith.constant dense<0xFF800000> : vector<8xf32>
      %29 = vector.multi_reduction <maximumf>, %27, %cst_17 [1] : vector<8x8xf32> to vector<8xf32>
      %30 = vector.shape_cast %29 : vector<8xf32> to vector<8x1xf32>
      %31 = arith.maximumf %28, %30 : vector<8x1xf32>
      %c0_18 = arith.constant 0 : index
      %c0_19 = arith.constant 0 : index
      %32 = vector.load %arg8[%c0_18, %c0_19] : memref<8x1xf32, #tpu.memory_space<vmem>>, vector<8x1xf32>
      %33 = arith.subf %32, %31 : vector<8x1xf32>
      %34 = math.exp %33 : vector<8x1xf32>
      %35 = vector.broadcast %31 : vector<8x1xf32> to vector<8x8xf32>
      %36 = arith.subf %27, %35 : vector<8x8xf32>
      %37 = math.exp %36 : vector<8x8xf32>
      %c0_20 = arith.constant 0 : index
      %c0_21 = arith.constant 0 : index
      %38 = vector.load %arg9[%c0_20, %c0_21] : memref<8x1xf32, #tpu.memory_space<vmem>>, vector<8x1xf32>
      %39 = arith.mulf %34, %38 : vector<8x1xf32>
      %cst_22 = arith.constant dense<0.000000e+00> : vector<8xf32>
      %40 = vector.multi_reduction <add>, %37, %cst_22 [1] : vector<8x8xf32> to vector<8xf32>
      %41 = vector.shape_cast %40 : vector<8xf32> to vector<8x1xf32>
      %42 = arith.addf %39, %41 : vector<8x1xf32>
      %c0_23 = arith.constant 0 : index
      %c0_24 = arith.constant 0 : index
      %43 = vector.load %arg9[%c0_23, %c0_24] : memref<8x1xf32, #tpu.memory_space<vmem>>, vector<8x1xf32>
      tpu.vector_store %arg9[%c0_23, %c0_24], %42 {strides = array<i32>} : memref<8x1xf32, #tpu.memory_space<vmem>>, vector<8x1xf32>,
      %c0_25 = arith.constant 0 : index
      %c0_26 = arith.constant 0 : index
      %44 = vector.load %arg10[%c0_25, %c0_26] : memref<8x16xf32, #tpu.memory_space<vmem>>, vector<8x16xf32>
      %45 = vector.broadcast %34 : vector<8x1xf32> to vector<8x16xf32>
      %46 = arith.mulf %45, %44 : vector<8x16xf32>
      %47 = arith.truncf %37 : vector<8x8xf32> to vector<8x8xbf16>
      %c0_27 = arith.constant 0 : index
      %c0_28 = arith.constant 0 : index
      %c0_29 = arith.constant 0 : index
      %c0_30 = arith.constant 0 : index
      %48 = vector.load %arg6[%c0_27, %c0_28, %c0_29, %c0_30] : memref<1x1x8x16xbf16, #tpu.memory_space<vmem>>, vector<1x1x8x16xbf16>
      %49 = vector.shape_cast %48 : vector<1x1x8x16xbf16> to vector<8x16xbf16>
      %cst_31 = arith.constant dense<0.000000e+00> : vector<8x16xf32>
      %50 = tpu.matmul %47, %49, %cst_31 {dimension_numbers = #tpu.dot_dimension_numbers<[1], [0], [0], [1], [0, 0, 1, 1], [], []>} : vector<8x8xbf16>, vector<8x16xbf16>, vector<8x16xf32> -> vector<8x16xf32>
      %51 = arith.addf %46, %50 : vector<8x16xf32>
      %c0_32 = arith.constant 0 : index
      %c0_33 = arith.constant 0 : index
      %52 = vector.load %arg10[%c0_32, %c0_33] : memref<8x16xf32, #tpu.memory_space<vmem>>, vector<8x16xf32>
      tpu.vector_store %arg10[%c0_32, %c0_33], %51 {strides = array<i32>} : memref<8x16xf32, #tpu.memory_space<vmem>>, vector<8x16xf32>,
      %c0_34 = arith.constant 0 : index
      %c0_35 = arith.constant 0 : index
      %53 = vector.load %arg8[%c0_34, %c0_35] : memref<8x1xf32, #tpu.memory_space<vmem>>, vector<8x1xf32>
      tpu.vector_store %arg8[%c0_34, %c0_35], %31 {strides = array<i32>} : memref<8x1xf32, #tpu.memory_space<vmem>>, vector<8x1xf32>,
    } else {
    }
    %c0_i32_3 = arith.constant 0 : i32
    %9 = arith.cmpi eq, %arg3, %c0_i32_3 : i32
    %10 = arith.extui %9 : i1 to i32
    %c0_i32_4 = arith.constant 0 : i32
    %11 = arith.cmpi ne, %10, %c0_i32_4 : i32
    scf.if %11 {
      %c0 = arith.constant 0 : index
      %c0_5 = arith.constant 0 : index
      %12 = vector.load %arg9[%c0, %c0_5] : memref<8x1xf32, #tpu.memory_space<vmem>>, vector<8x1xf32>
      %13 = tpu.reciprocal %12 {approx = true} : vector<8x1xf32> -> vector<8x1xf32>
      %c0_6 = arith.constant 0 : index
      %c0_7 = arith.constant 0 : index
      %14 = vector.load %arg10[%c0_6, %c0_7] : memref<8x16xf32, #tpu.memory_space<vmem>>, vector<8x16xf32>
      %15 = vector.broadcast %13 : vector<8x1xf32> to vector<8x16xf32>
      %16 = arith.mulf %14, %15 : vector<8x16xf32>
      %17 = arith.truncf %16 : vector<8x16xf32> to vector<8x16xbf16>
      %c0_8 = arith.constant 0 : index
      %c0_9 = arith.constant 0 : index
      %c0_10 = arith.constant 0 : index
      %c0_11 = arith.constant 0 : index
      %18 = vector.load %arg7[%c0_8, %c0_9, %c0_10, %c0_11] : memref<1x1x8x16xbf16, #tpu.memory_space<vmem>>, vector<1x1x8x16xbf16>
      %19 = vector.shape_cast %18 : vector<1x1x8x16xbf16> to vector<8x16xbf16>
      %20 = vector.shape_cast %17 : vector<8x16xbf16> to vector<1x1x8x16xbf16>
      tpu.vector_store %arg7[%c0_8, %c0_9, %c0_10, %c0_11], %20 {strides = array<i32>} : memref<1x1x8x16xbf16, #tpu.memory_space<vmem>>, vector<1x1x8x16xbf16>,
    } else {
    }
    return
  }
  func.func @transform_0(%arg0: i32, %arg1: i32, %arg2: i32, %arg3: i32) -> (i32, i32, i32, i32) {
    %c0_i32 = arith.constant 0 : i32
    %c0_i32_0 = arith.constant 0 : i32
    return %arg0, %arg1, %arg2, %c0_i32 : i32, i32, i32, i32
  }
  func.func @transform_1(%arg0: i32, %arg1: i32, %arg2: i32, %arg3: i32) -> (i32, i32, i32, i32) {
    %c0_i32 = arith.constant 0 : i32
    %c0_i32_0 = arith.constant 0 : i32
    return %arg0, %arg1, %arg3, %c0_i32 : i32, i32, i32, i32
  }
  func.func @transform_2(%arg0: i32, %arg1: i32, %arg2: i32, %arg3: i32) -> (i32, i32, i32, i32) {
    %c0_i32 = arith.constant 0 : i32
    %c0_i32_0 = arith.constant 0 : i32
    return %arg0, %arg1, %arg3, %c0_i32 : i32, i32, i32, i32
  }
  func.func @transform_3(%arg0: i32, %arg1: i32, %arg2: i32, %arg3: i32) -> (i32, i32, i32, i32) {
    %c0_i32 = arith.constant 0 : i32
    %c0_i32_0 = arith.constant 0 : i32
    return %arg0, %arg1, %arg2, %c0_i32 : i32, i32, i32, i32
  }
}

module attributes {stable_mosaic.version = 11 : i64} {
  func.func @_fused_linear_kernel(%arg0: i32, %arg1: i32, %arg2: memref<16x128xbf16, #tpu.memory_space<vmem>>, %arg3: memref<128x32xbf16, #tpu.memory_space<vmem>>, %arg4: memref<1x32xf32, #tpu.memory_space<vmem>>, %arg5: memref<16x32xf32, #tpu.memory_space<vmem>>, %arg6: memref<16x32xf32, #tpu.memory_space<vmem>>) attributes {dimension_semantics = [#tpu.dimension_semantics<parallel>, #tpu.dimension_semantics<parallel>], iteration_bounds = array<i64: 1, 1>, scalar_prefetch = 0 : i64, scratch_operands = 0 : i64, tpu.core_type = #tpu.core_type<tc>, window_params = [{transform_indices = @transform_0, window_bounds = array<i64: 16, 128>}, {transform_indices = @transform_1, window_bounds = array<i64: 128, 32>}, {transform_indices = @transform_2, window_bounds = array<i64: 1, 32>}, {transform_indices = @transform_3, window_bounds = array<i64: 16, 32>}, {transform_indices = @transform_4, window_bounds = array<i64: 16, 32>}]} {
    %c0 = arith.constant 0 : index
    %c0_0 = arith.constant 0 : index
    %0 = vector.load %arg2[%c0, %c0_0] : memref<16x128xbf16, #tpu.memory_space<vmem>>, vector<16x128xbf16>
    %c0_1 = arith.constant 0 : index
    %c0_2 = arith.constant 0 : index
    %1 = vector.load %arg3[%c0_1, %c0_2] : memref<128x32xbf16, #tpu.memory_space<vmem>>, vector<128x32xbf16>
    %cst = arith.constant dense<0.000000e+00> : vector<16x32xf32>
    %2 = tpu.matmul %0, %1, %cst {dimension_numbers = #tpu.dot_dimension_numbers<[1], [0], [0], [1], [0, 0, 1, 1], [], []>} : vector<16x128xbf16>, vector<128x32xbf16>, vector<16x32xf32> -> vector<16x32xf32>
    %c0_3 = arith.constant 0 : index
    %c0_4 = arith.constant 0 : index
    %3 = vector.load %arg4[%c0_3, %c0_4] : memref<1x32xf32, #tpu.memory_space<vmem>>, vector<1x32xf32>
    %4 = vector.broadcast %3 : vector<1x32xf32> to vector<16x32xf32>
    %5 = arith.addf %2, %4 : vector<16x32xf32>
    %c0_5 = arith.constant 0 : index
    %c0_6 = arith.constant 0 : index
    %6 = vector.load %arg5[%c0_5, %c0_6] : memref<16x32xf32, #tpu.memory_space<vmem>>, vector<16x32xf32>
    %7 = arith.addf %5, %6 : vector<16x32xf32>
    %c0_7 = arith.constant 0 : index
    %c0_8 = arith.constant 0 : index
    %8 = vector.load %arg6[%c0_7, %c0_8] : memref<16x32xf32, #tpu.memory_space<vmem>>, vector<16x32xf32>
    tpu.vector_store %arg6[%c0_7, %c0_8], %7 {strides = array<i32>} : memref<16x32xf32, #tpu.memory_space<vmem>>, vector<16x32xf32>,
    return
  }
  func.func @transform_0(%arg0: i32, %arg1: i32) -> (i32, i32) {
    %c0_i32 = arith.constant 0 : i32
    %c0_i32_0 = arith.constant 0 : i32
    return %arg0, %c0_i32 : i32, i32
  }
  func.func @transform_1(%arg0: i32, %arg1: i32) -> (i32, i32) {
    %c0_i32 = arith.constant 0 : i32
    %c0_i32_0 = arith.constant 0 : i32
    return %c0_i32, %arg1 : i32, i32
  }
  func.func @transform_2(%arg0: i32, %arg1: i32) -> (i32, i32) {
    %c0_i32 = arith.constant 0 : i32
    %c0_i32_0 = arith.constant 0 : i32
    return %c0_i32, %arg1 : i32, i32
  }
  func.func @transform_3(%arg0: i32, %arg1: i32) -> (i32, i32) {
    %c0_i32 = arith.constant 0 : i32
    return %arg0, %arg1 : i32, i32
  }
  func.func @transform_4(%arg0: i32, %arg1: i32) -> (i32, i32) {
    %c0_i32 = arith.constant 0 : i32
    return %arg0, %arg1 : i32, i32
  }
}

module attributes {stable_mosaic.version = 11 : i64} {
  func.func @_fused_linear_kernel(%arg0: i32, %arg1: i32, %arg2: memref<16x32xf32, #tpu.memory_space<vmem>>, %arg3: memref<32x1xbf16, #tpu.memory_space<vmem>>, %arg4: memref<1x1xf32, #tpu.memory_space<vmem>>, %arg5: memref<1x32xf32, #tpu.memory_space<vmem>>, %arg6: memref<1x32xf32, #tpu.memory_space<vmem>>, %arg7: memref<16x1xf32, #tpu.memory_space<vmem>>) attributes {dimension_semantics = [#tpu.dimension_semantics<parallel>, #tpu.dimension_semantics<parallel>], iteration_bounds = array<i64: 1, 1>, scalar_prefetch = 0 : i64, scratch_operands = 0 : i64, tpu.core_type = #tpu.core_type<tc>, window_params = [{transform_indices = @transform_0, window_bounds = array<i64: 16, 32>}, {transform_indices = @transform_1, window_bounds = array<i64: 32, 1>}, {transform_indices = @transform_2, window_bounds = array<i64: 1, 1>}, {pipeline_mode = #tpu.pipeline_mode<synchronous>, transform_indices = @transform_3, window_bounds = array<i64: 1, 32>}, {pipeline_mode = #tpu.pipeline_mode<synchronous>, transform_indices = @transform_4, window_bounds = array<i64: 1, 32>}, {transform_indices = @transform_5, window_bounds = array<i64: 16, 1>}]} {
    %c0 = arith.constant 0 : index
    %c0_0 = arith.constant 0 : index
    %0 = vector.load %arg2[%c0, %c0_0] : memref<16x32xf32, #tpu.memory_space<vmem>>, vector<16x32xf32>
    %c0_1 = arith.constant 0 : index
    %c0_2 = arith.constant 0 : index
    %1 = vector.load %arg5[%c0_1, %c0_2] : memref<1x32xf32, #tpu.memory_space<vmem>>, vector<1x32xf32>
    %c0_3 = arith.constant 0 : index
    %c0_4 = arith.constant 0 : index
    %2 = vector.load %arg6[%c0_3, %c0_4] : memref<1x32xf32, #tpu.memory_space<vmem>>, vector<1x32xf32>
    %cst = arith.constant dense<0.000000e+00> : vector<16xf32>
    %3 = vector.multi_reduction <add>, %0, %cst [1] : vector<16x32xf32> to vector<16xf32>
    %4 = vector.shape_cast %3 : vector<16xf32> to vector<16x1xf32>
    %cst_5 = arith.constant 3.200000e+01 : f32
    %5 = vector.broadcast %cst_5 : f32 to vector<16x1xf32>
    %6 = arith.divf %4, %5 : vector<16x1xf32>
    %7 = vector.broadcast %6 : vector<16x1xf32> to vector<16x32xf32>
    %8 = arith.subf %0, %7 : vector<16x32xf32>
    %9 = arith.mulf %8, %8 : vector<16x32xf32>
    %cst_6 = arith.constant dense<0.000000e+00> : vector<16xf32>
    %10 = vector.multi_reduction <add>, %9, %cst_6 [1] : vector<16x32xf32> to vector<16xf32>
    %11 = vector.shape_cast %10 : vector<16xf32> to vector<16x1xf32>
    %cst_7 = arith.constant 3.200000e+01 : f32
    %12 = vector.broadcast %cst_7 : f32 to vector<16x1xf32>
    %13 = arith.divf %11, %12 : vector<16x1xf32>
    %14 = vector.broadcast %6 : vector<16x1xf32> to vector<16x32xf32>
    %15 = arith.subf %0, %14 : vector<16x32xf32>
    %cst_8 = arith.constant 9.99999974E-6 : f32
    %16 = vector.broadcast %cst_8 : f32 to vector<16x1xf32>
    %17 = arith.addf %13, %16 : vector<16x1xf32>
    %18 = math.rsqrt %17 : vector<16x1xf32>
    %19 = vector.broadcast %18 : vector<16x1xf32> to vector<16x32xf32>
    %20 = arith.mulf %15, %19 : vector<16x32xf32>
    %21 = vector.broadcast %1 : vector<1x32xf32> to vector<16x32xf32>
    %22 = arith.mulf %20, %21 : vector<16x32xf32>
    %23 = vector.broadcast %2 : vector<1x32xf32> to vector<16x32xf32>
    %24 = arith.addf %22, %23 : vector<16x32xf32>
    %25 = arith.truncf %24 : vector<16x32xf32> to vector<16x32xbf16>
    %c0_9 = arith.constant 0 : index
    %c0_10 = arith.constant 0 : index
    %26 = vector.load %arg3[%c0_9, %c0_10] : memref<32x1xbf16, #tpu.memory_space<vmem>>, vector<32x1xbf16>
    %cst_11 = arith.constant dense<0.000000e+00> : vector<16x1xf32>
    %27 = tpu.matmul %25, %26, %cst_11 {dimension_numbers = #tpu.dot_dimension_numbers<[1], [0], [0], [1], [0, 0, 1, 1], [], []>} : vector<16x32xbf16>, vector<32x1xbf16>, vector<16x1xf32> -> vector<16x1xf32>
    %c0_12 = arith.constant 0 : index
    %c0_13 = arith.constant 0 : index
    %28 = vector.load %arg4[%c0_12, %c0_13] : memref<1x1xf32, #tpu.memory_space<vmem>>, vector<1x1xf32>
    %29 = vector.broadcast %28 : vector<1x1xf32> to vector<16x1xf32>
    %30 = arith.addf %27, %29 : vector<16x1xf32>
    %c0_14 = arith.constant 0 : index
    %c0_15 = arith.constant 0 : index
    %31 = vector.load %arg7[%c0_14, %c0_15] : memref<16x1xf32, #tpu.memory_space<vmem>>, vector<16x1xf32>
    tpu.vector_store %arg7[%c0_14, %c0_15], %30 {strides = array<i32>} : memref<16x1xf32, #tpu.memory_space<vmem>>, vector<16x1xf32>,
    return
  }
  func.func @transform_0(%arg0: i32, %arg1: i32) -> (i32, i32) {
    %c0_i32 = arith.constant 0 : i32
    %c0_i32_0 = arith.constant 0 : i32
    return %arg0, %c0_i32 : i32, i32
  }
  func.func @transform_1(%arg0: i32, %arg1: i32) -> (i32, i32) {
    %c0_i32 = arith.constant 0 : i32
    %c0_i32_0 = arith.constant 0 : i32
    return %c0_i32, %arg1 : i32, i32
  }
  func.func @transform_2(%arg0: i32, %arg1: i32) -> (i32, i32) {
    %c0_i32 = arith.constant 0 : i32
    %c0_i32_0 = arith.constant 0 : i32
    return %c0_i32, %arg1 : i32, i32
  }
  func.func @transform_3(%arg0: i32, %arg1: i32) -> (i32, i32) {
    %c0_i32 = arith.constant 0 : i32
    %c0_i32_0 = arith.constant 0 : i32
    %c0_i32_1 = arith.constant 0 : i32
    return %c0_i32, %c0_i32_0 : i32, i32
  }
  func.func @transform_4(%arg0: i32, %arg1: i32) -> (i32, i32) {
    %c0_i32 = arith.constant 0 : i32
    %c0_i32_0 = arith.constant 0 : i32
    %c0_i32_1 = arith.constant 0 : i32
    return %c0_i32, %c0_i32_0 : i32, i32
  }
  func.func @transform_5(%arg0: i32, %arg1: i32) -> (i32, i32) {
    %c0_i32 = arith.constant 0 : i32
    return %arg0, %arg1 : i32, i32
  }
}

module attributes {stable_mosaic.version = 11 : i64} {
  func.func @_fused_linear_kernel(%arg0: i32, %arg1: i32, %arg2: memref<16x32xf32, #tpu.memory_space<vmem>>, %arg3: memref<32x128xbf16, #tpu.memory_space<vmem>>, %arg4: memref<1x128xf32, #tpu.memory_space<vmem>>, %arg5: memref<1x32xf32, #tpu.memory_space<vmem>>, %arg6: memref<1x32xf32, #tpu.memory_space<vmem>>, %arg7: memref<16x128xbf16, #tpu.memory_space<vmem>>) attributes {dimension_semantics = [#tpu.dimension_semantics<parallel>, #tpu.dimension_semantics<parallel>], iteration_bounds = array<i64: 1, 1>, scalar_prefetch = 0 : i64, scratch_operands = 0 : i64, tpu.core_type = #tpu.core_type<tc>, window_params = [{transform_indices = @transform_0, window_bounds = array<i64: 16, 32>}, {transform_indices = @transform_1, window_bounds = array<i64: 32, 128>}, {transform_indices = @transform_2, window_bounds = array<i64: 1, 128>}, {pipeline_mode = #tpu.pipeline_mode<synchronous>, transform_indices = @transform_3, window_bounds = array<i64: 1, 32>}, {pipeline_mode = #tpu.pipeline_mode<synchronous>, transform_indices = @transform_4, window_bounds = array<i64: 1, 32>}, {transform_indices = @transform_5, window_bounds = array<i64: 16, 128>}]} {
    %c0 = arith.constant 0 : index
    %c0_0 = arith.constant 0 : index
    %0 = vector.load %arg2[%c0, %c0_0] : memref<16x32xf32, #tpu.memory_space<vmem>>, vector<16x32xf32>
    %c0_1 = arith.constant 0 : index
    %c0_2 = arith.constant 0 : index
    %1 = vector.load %arg5[%c0_1, %c0_2] : memref<1x32xf32, #tpu.memory_space<vmem>>, vector<1x32xf32>
    %c0_3 = arith.constant 0 : index
    %c0_4 = arith.constant 0 : index
    %2 = vector.load %arg6[%c0_3, %c0_4] : memref<1x32xf32, #tpu.memory_space<vmem>>, vector<1x32xf32>
    %cst = arith.constant dense<0.000000e+00> : vector<16xf32>
    %3 = vector.multi_reduction <add>, %0, %cst [1] : vector<16x32xf32> to vector<16xf32>
    %4 = vector.shape_cast %3 : vector<16xf32> to vector<16x1xf32>
    %cst_5 = arith.constant 3.200000e+01 : f32
    %5 = vector.broadcast %cst_5 : f32 to vector<16x1xf32>
    %6 = arith.divf %4, %5 : vector<16x1xf32>
    %7 = vector.broadcast %6 : vector<16x1xf32> to vector<16x32xf32>
    %8 = arith.subf %0, %7 : vector<16x32xf32>
    %9 = arith.mulf %8, %8 : vector<16x32xf32>
    %cst_6 = arith.constant dense<0.000000e+00> : vector<16xf32>
    %10 = vector.multi_reduction <add>, %9, %cst_6 [1] : vector<16x32xf32> to vector<16xf32>
    %11 = vector.shape_cast %10 : vector<16xf32> to vector<16x1xf32>
    %cst_7 = arith.constant 3.200000e+01 : f32
    %12 = vector.broadcast %cst_7 : f32 to vector<16x1xf32>
    %13 = arith.divf %11, %12 : vector<16x1xf32>
    %14 = vector.broadcast %6 : vector<16x1xf32> to vector<16x32xf32>
    %15 = arith.subf %0, %14 : vector<16x32xf32>
    %cst_8 = arith.constant 9.99999974E-6 : f32
    %16 = vector.broadcast %cst_8 : f32 to vector<16x1xf32>
    %17 = arith.addf %13, %16 : vector<16x1xf32>
    %18 = math.rsqrt %17 : vector<16x1xf32>
    %19 = vector.broadcast %18 : vector<16x1xf32> to vector<16x32xf32>
    %20 = arith.mulf %15, %19 : vector<16x32xf32>
    %21 = vector.broadcast %1 : vector<1x32xf32> to vector<16x32xf32>
    %22 = arith.mulf %20, %21 : vector<16x32xf32>
    %23 = vector.broadcast %2 : vector<1x32xf32> to vector<16x32xf32>
    %24 = arith.addf %22, %23 : vector<16x32xf32>
    %25 = arith.truncf %24 : vector<16x32xf32> to vector<16x32xbf16>
    %c0_9 = arith.constant 0 : index
    %c0_10 = arith.constant 0 : index
    %26 = vector.load %arg3[%c0_9, %c0_10] : memref<32x128xbf16, #tpu.memory_space<vmem>>, vector<32x128xbf16>
    %cst_11 = arith.constant dense<0.000000e+00> : vector<16x128xf32>
    %27 = tpu.matmul %25, %26, %cst_11 {dimension_numbers = #tpu.dot_dimension_numbers<[1], [0], [0], [1], [0, 0, 1, 1], [], []>} : vector<16x32xbf16>, vector<32x128xbf16>, vector<16x128xf32> -> vector<16x128xf32>
    %c0_12 = arith.constant 0 : index
    %c0_13 = arith.constant 0 : index
    %28 = vector.load %arg4[%c0_12, %c0_13] : memref<1x128xf32, #tpu.memory_space<vmem>>, vector<1x128xf32>
    %29 = vector.broadcast %28 : vector<1x128xf32> to vector<16x128xf32>
    %30 = arith.addf %27, %29 : vector<16x128xf32>
    %cst_14 = arith.constant 5.000000e-01 : f32
    %31 = vector.broadcast %cst_14 : f32 to vector<16x128xf32>
    %32 = arith.mulf %31, %30 : vector<16x128xf32>
    %cst_15 = arith.constant 4.471500e-02 : f32
    %33 = vector.broadcast %cst_15 : f32 to vector<16x128xf32>
    %34 = arith.mulf %33, %30 : vector<16x128xf32>
    %35 = arith.mulf %34, %30 : vector<16x128xf32>
    %36 = arith.mulf %35, %30 : vector<16x128xf32>
    %37 = arith.addf %30, %36 : vector<16x128xf32>
    %cst_16 = arith.constant 0.797884583 : f32
    %38 = vector.broadcast %cst_16 : f32 to vector<16x128xf32>
    %39 = arith.mulf %38, %37 : vector<16x128xf32>
    %40 = math.tanh %39 : vector<16x128xf32>
    %cst_17 = arith.constant 1.000000e+00 : f32
    %41 = vector.broadcast %cst_17 : f32 to vector<16x128xf32>
    %42 = arith.addf %41, %40 : vector<16x128xf32>
    %43 = arith.mulf %32, %42 : vector<16x128xf32>
    %44 = arith.truncf %43 : vector<16x128xf32> to vector<16x128xbf16>
    %c0_18 = arith.constant 0 : index
    %c0_19 = arith.constant 0 : index
    %45 = vector.load %arg7[%c0_18, %c0_19] : memref<16x128xbf16, #tpu.memory_space<vmem>>, vector<16x128xbf16>
    tpu.vector_store %arg7[%c0_18, %c0_19], %44 {strides = array<i32>} : memref<16x128xbf16, #tpu.memory_space<vmem>>, vector<16x128xbf16>,
    return
  }
  func.func @transform_0(%arg0: i32, %arg1: i32) -> (i32, i32) {
    %c0_i32 = arith.constant 0 : i32
    %c0_i32_0 = arith.constant 0 : i32
    return %arg0, %c0_i32 : i32, i32
  }
  func.func @transform_1(%arg0: i32, %arg1: i32) -> (i32, i32) {
    %c0_i32 = arith.constant 0 : i32
    %c0_i32_0 = arith.constant 0 : i32
    return %c0_i32, %arg1 : i32, i32
  }
  func.func @transform_2(%arg0: i32, %arg1: i32) -> (i32, i32) {
    %c0_i32 = arith.constant 0 : i32
    %c0_i32_0 = arith.constant 0 : i32
    return %c0_i32, %arg1 : i32, i32
  }
  func.func @transform_3(%arg0: i32, %arg1: i32) -> (i32, i32) {
    %c0_i32 = arith.constant 0 : i32
    %c0_i32_0 = arith.constant 0 : i32
    %c0_i32_1 = arith.constant 0 : i32
    return %c0_i32, %c0_i32_0 : i32, i32
  }
  func.func @transform_4(%arg0: i32, %arg1: i32) -> (i32, i32) {
    %c0_i32 = arith.constant 0 : i32
    %c0_i32_0 = arith.constant 0 : i32
    %c0_i32_1 = arith.constant 0 : i32
    return %c0_i32, %c0_i32_0 : i32, i32
  }
  func.func @transform_5(%arg0: i32, %arg1: i32) -> (i32, i32) {
    %c0_i32 = arith.constant 0 : i32
    return %arg0, %arg1 : i32, i32
  }
}

</mosaic_0001>

<bundles_post_ra>
// kernel: transformer_forward.17
= control target key start
LH: loop header
LB: loop body
LE: loop exit
PB: predicated region body
PF: predicated region fallthrough
CT: control target
= control target key end

     0   :  { %s491_s15 = smov 0   ;;  %s493_s16 = smov 0   ;;  %s533_s0 = inlined_call_operand.vmem [shape: f32[2,8,4], index: 0, kind: input, shape index: {}]   ;;  %s534_s1 = inlined_call_operand.vmem [shape: bf16[4,32], index: 1, kind: input, shape index: {}]   ;;  %s535_s2 = inlined_call_operand.vmem [shape: f32[1,32], index: 2, kind: input, shape index: {}]   ;;  %s536_s3 = inlined_call_operand.vmem [shape: f32[16,32], index: 3, kind: input, shape index: {}]   ;;  %s537_s4 = inlined_call_operand.vmem [shape: f32[2,8,32], index: 4, kind: output, shape index: {}]  }
   0x1   :  { %s495_s17 = smov 0  }
   0x2 LB: > { %s26_s18 = sadd.s32 1, %s458_s16  ;;  %p399_p0 = scmp.ge.s32.totalorder %s462_s17, 1  ;;  %s462_s17 = sphi %s495_s17, %s14_s17   ;;  %s458_s16 = sphi %s493_s16, %s539_s16   ;;  %s454_s15 = sphi %s491_s15, %s538_s15  }
   0x3   : > { %p28_p1 = scmp.ge.s32.totalorder %s26_s18, 2  ;;  %p189_p2 = scmp.lt.s32.totalorder %s462_s17, 3 }
   0x5   : > { %s541_s18 = smov (%p28_p1, %s26_s18), 0  ;;  %p190_p3 = pnand %p399_p0, %p189_p2 }
   0x6   : > { %v244_v0 = vld [vmem:[%s534_s1] sm:$0x3] (!%p190_p3)  ;;  %vm256_vm0 = vcmask (!%p190_p3), 1041408   ;;  %p223_p4 = scmp.lt.s32.totalorder (!%p190_p3), %s454_s15, 1  ;;  %v464_v1 = vmov (!%p190_p3), 0.0   ;;  %vm465_vm1 = vmmov (!%p190_p3), 0  }
   0x7   : > { %193 = sbr.rel (%p190_p3) target bundleno = 237 (0xed), region = 36  ;;  %408 = vmatprep.subr.bf16.mxu0 (!%p190_p3), %v464_v1  ;;  %v258_v2 = vsel (!%p190_p3), %vm256_vm0, %v244_v0, 0  ;;  %410 = vmatprep.mubr.msk.bf16.mxu0 (!%p190_p3), %vm465_vm1, %v464_v1  ;;  %vm252_vm2 = vcmask (!%p190_p3), 31744   ;;  %v402_v5 = vld [vmem:[%s535_s2] ss:$0 sm:$0xff] (!%p190_p3)  ;;  %vm302_vm3 = vcmask (!%p190_p3), 261120  }
   0x8   : > { %409 = vmatpush3.bf16.msra.mxu0 (!%p190_p3), %v258_v2  ;;  %v300_v7 = vld [vmem:[%s536_s3] sm:$0xff] (!%p190_p3) }
   0xe   : > { %s543_s15 = smov (!%p223_p4, %s454_s15), 1 }
   0xf   : > { %s400_s21 = sshll.u32 %s543_s15, 3 }
  0x10   : > { %s229_s24 = scalar_lea.vmem %s533_s0, %s400_s21  ;;  %s240_s5 = scalar_lea.vmem %s537_s4, %s400_s21 }
  0x11   : > { %v242_v3 = vld [vmem:[%s229_s24] sm:$0xff] }
  0x12   : > { %v243_v4 = vpack.c.bf16 %v242_v3, %v242_v3 }
  0x14   : > { %411 = vmatmul.mubr.msk.bf16.vlgmr.msra.gmra.mrb[0].mxu0 %vm252_vm2, %v243_v4 }
  0xe7   : > { %v294_v6 = vpop.f32.mrb[0].mxu0 }
  0xe8   : > { %v295_v8 = vadd.f32 %v402_v5, %v294_v6  ;;  %v412_v9 = vpop.f32.mrb[1].mxu0 }
  0xe9   : > { %v297_v10 = vpop.f32.mrb[2].mxu0 }
  0xea   : > { %v301_v11 = vadd.f32 %v300_v7, %v295_v8  ;;  %v413_v12 = vpop.f32.mrb[3].mxu0 }
  0xec   : > { %303 = vst.msk [vmem:[%s240_s5] sm:$0xff] %vm302_vm3, %v301_v11 }
  0xed PF: > { %s14_s17 = sadd.s32 1, %s462_s17   ;;  %s538_s15 = smov %s458_s16 }
  0xee   : > { %p11_p5 = scmp.ge.s32.totalorder %s14_s17, 4   ;;  %s539_s16 = smov %s541_s18 }
  0xf0   :  { %13 = sbr.rel (!%p11_p5) target bundleno = 2 (0x2), region = 69 }

// kernel: transformer_forward.18
= control target key start
LH: loop header
LB: loop body
LE: loop exit
PB: predicated region body
PF: predicated region fallthrough
CT: control target
= control target key end

     0   :  { %s1327_s17 = smov 0   ;;  %s1329_s18 = smov 0   ;;  %s1470_s0 = inlined_call_operand.vmem [shape: f32[2,8,32], index: 0, kind: input, shape index: {}]   ;;  %s1471_s1 = inlined_call_operand.vmem [shape: f32[1,32], index: 1, kind: input, shape index: {}]   ;;  %s1472_s2 = inlined_call_operand.vmem [shape: f32[1,32], index: 2, kind: input, shape index: {}]   ;;  %s1473_s3 = inlined_call_operand.vmem [shape: bf16[2,32,16], index: 3, kind: input, shape index: {}]   ;;  %s1474_s4 = inlined_call_operand.vmem [shape: bf16[2,32,16], index: 4, kind: input, shape index: {}]   ;;  %s1475_s5 = inlined_call_operand.vmem [shape: bf16[2,32,16], index: 5, kind: input, shape index: {}]   ;;  %s1476_s6 = inlined_call_operand.vmem [shape: f32[2,1,16], index: 6, kind: input, shape index: {}]   ;;  %s1477_s7 = inlined_call_operand.vmem [shape: f32[2,1,16], index: 7, kind: input, shape index: {}]   ;;  %s1478_s8 = inlined_call_operand.vmem [shape: f32[2,1,16], index: 8, kind: input, shape index: {}]   ;;  %s1479_s9 = inlined_call_operand.vmem [shape: bf16[2,2,8,16], index: 9, kind: output, shape index: {0}]   ;;  %s1480_s10 = inlined_call_operand.vmem [shape: bf16[2,2,8,16], index: 10, kind: output, shape index: {1}]   ;;  %s1481_s11 = inlined_call_operand.vmem [shape: bf16[2,2,8,16], index: 11, kind: output, shape index: {2}]  }
   0x1   :  { %1485 = sst [smem:[#allocation8_spill]] %s1470_s0  ;;  %s1331_s19 = smov 0  }
   0x2   :  { %1486 = sst [smem:[#allocation9_spill]] %s1473_s3  ;;  %s1333_s20 = smov 0  }
   0x3   :  { %1487 = sst [smem:[#allocation10_spill]] %s1474_s4  ;;  %s1335_s21 = smov 0  }
   0x4 LB: > { %1488 = sst [smem:[#allocation3_spill]] %s1255_s19  ;;  %s34_s22 = sadd.s32 1, %s1255_s19  ;;  %s1263_s21 = sphi %s1335_s21, %s22_s21   ;;  %s1259_s20 = sphi %s1333_s20, %s1501_s20   ;;  %s1255_s19 = sphi %s1331_s19, %s1500_s19   ;;  %s1251_s18 = sphi %s1329_s18, %s1499_s18   ;;  %s1247_s17 = sphi %s1327_s17, %s1498_s17  }
   0x5   : > { %1489 = sst [smem:[#allocation4_spill]] %s1259_s20  ;;  %s41_s23 = sadd.s32 1, %s1259_s20 }
   0x6   : > { %1490 = sst [smem:[#allocation5_spill]] %s1263_s21  ;;  %p35_p0 = scmp.ge.s32.totalorder %s34_s22, 2 }
   0x7   : > { %p1108_p1 = scmp.ge.s32.totalorder %s1263_s21, 1  ;;  %p431_p2 = scmp.lt.s32.totalorder %s1263_s21, 5 }
   0x8   : > { %s1503_s22 = smov (%p35_p0, %s34_s22), 0  ;;  %s1505_s23 = smov (!%p35_p0, %s41_s23), %s1259_s20 }
   0x9   : > { %1491 = sst [smem:[#allocation6_spill]] %s1503_s22  ;;  %p432_p3 = pnand %p1108_p1, %p431_p2 }
   0xa   : > { %p43_p4 = scmp.ge.s32.totalorder %s1505_s23, 2  ;;  %p525_p5 = scmp.lt.s32.totalorder (!%p432_p3), %s1251_s18, 1 }
   0xb   : > { %435 = sbr.rel (%p432_p3) target bundleno = 573 (0x23d), region = 56  ;;  %p532_p6 = scmp.lt.s32.totalorder (!%p432_p3), %s1247_s17, 1 }
   0xc   : > { %s1507_s23 = smov (%p43_p4, %s1505_s23), 0  ;;  %s1493_s0 = sld [smem:[#allocation8_spill]] (!%p432_p3) }
   0xd   : > { %1492 = sst [smem:[#allocation7_spill]] %s1507_s23  ;;  %s1494_s3 = sld [smem:[#allocation9_spill]] (!%p432_p3) }
   0xe   : > { %s1495_s4 = sld [smem:[#allocation10_spill]] (!%p432_p3)  ;;  %p1122_p7 = scmp.ne.s32.totalorder (!%p432_p3), %s1247_s17, 0 }
  0x12   : > { %s1509_s18 = smov (!%p525_p5, %s1251_s18), 1  ;;  %vm597_vm0 = vcmask (!%p1122_p7), 261120   ;;  %v1123_v11 = vld [vmem:[%s1471_s1] ss:$0 sm:$0xff] (!%p1122_p7)  ;;  %vm627_vm1 = vcmask (!%p1122_p7), 257024  }
  0x13   : > { %s1361_s24 = scalar_select %p532_p6, %s1247_s17, 1 }
  0x14   : > { %s1109_s25 = sshll.u32 %s1509_s18, 3  ;;  %s1116_s26 = sshll.u32 %s1509_s18, 1  ;;  %v1124_v13 = vld [vmem:[%s1472_s2] ss:$0 sm:$0xff] (!%p1122_p7) }
  0x15   : > { %s531_s29 = scalar_lea.vmem %s1493_s0, %s1109_s25  ;;  %s1139_s30 = sshll.u32 %s1361_s24, 4 }
  0x16   : > { %s1370_s14 = scalar_lea.vmem %s1494_s3, %s1139_s30  ;;  %s1375_s23 = scalar_lea.vmem %s1495_s4, %s1139_s30  ;;  %v594_v0 = vld [vmem:[%s531_s29] sm:$0xff] (!%p1122_p7) }
  0x17   : > { %s1380_s19 = scalar_lea.vmem %s1475_s5, %s1139_s30  ;;  %s549_s25 = scalar_lea.vmem %s1476_s6, %s1361_s24  ;;  %v598_v1 = vsel (!%p1122_p7), %vm597_vm0, %v594_v0, 0.0 }
  0x18   : > { %s555_s3 = scalar_lea.vmem %s1478_s8, %s1361_s24  ;;  %s564_s15 = sadd.s32 %s1116_s26, %s1361_s24  ;;  %599 = vadd.xlane.f32.xlu0 (!%p1122_p7), %v598_v1 }
  0x19   : > { %s1395_s16 = sshll.u32 %s564_s15, 2  ;;  %593 = sbr.rel (%p1122_p7) target bundleno = 339 (0x153), region = 60 }
  0x1a   : > { %s566_s22 = scalar_lea.vmem %s1479_s9, %s1395_s16  ;;  %s577_s18 = scalar_lea.vmem %s1480_s10, %s1395_s16 }
  0x1b   : > { %s588_s12 = scalar_lea.vmem %s1481_s11, %s1395_s16 }
  0xa5   : > { %v600_v2 = vpop.xlane.xlu0 %599 }
  0xa6   : > { %v602_v3 = vmul.f32 0.03125, %v600_v2 }
  0xa8   : > { %v603_v4 = vsub.f32 %v594_v0, %v602_v3 }
  0xaa   : > { %v604_v5 = vmul.f32 %v603_v4, %v603_v4 }
  0xac   : > { %v605_v6 = vsel %vm597_vm0, %v604_v5, 0.0 }
  0xad   : > { %606 = vadd.xlane.f32.xlu0 %v605_v6 }
 0x13a   : > { %v607_v7 = vpop.xlane.xlu0 %606 }
 0x13b   : > { %v608_v8 = vmul.f32 0.03125, %v607_v7 }
 0x13d   : > { %v609_v9 = vadd.f32 1e-05, %v608_v8 }
 0x13f   : > { %1217 = vrsqrt.f32 %v609_v9 }
 0x149   : > { %v1218_v10 = vpop.eup %1217 }
 0x14a   : > { %v611_v12 = vmul.f32 %v1218_v10, %v603_v4 }
 0x14c   : > { %v618_v14 = vmul.f32 %v1123_v11, %v611_v12 }
 0x14e   : > { %v625_v15 = vadd.f32 %v1124_v13, %v618_v14 }
 0x150   : > { %v626_v16 = vpack.c.bf16 %v625_v15, %v625_v15 }
 0x152   : > { %628 = vst.msk [vmem:[#allocation2] sm:$0xf] %vm627_vm1, %v626_v16 }
 0x153 PF: > { %v1219_v17 = vld [vmem:[%s1370_s14] sm:$0xff]   ;;  %v1265_v18 = vmov 0.0   ;;  %v1220_v19 = vld [vmem:[%s1370_s14 + $0x8] sm:$0xff]   ;;  %vm1266_vm2 = vmmov 0   ;;  %vm653_vm3 = vcmask 261120   ;;  %s1496_s15 = scalar_lea.vmem %s1477_s7, %s1361_s24  ;;  %vm699_vm4 = vcmask 125952  }
 0x154   : > { %1151 = vmatprep.subr.bf16.mxu0 %v1265_v18  ;;  %1159 = vmatprep.subr.bf16.mxu1 %v1265_v18  ;;  %v1221_v20 = vld [vmem:[%s1375_s23] sm:$0xff]   ;;  %v1223_v21 = vld [vmem:[%s1375_s23 + $0x8] sm:$0xff]  }
 0x155   : > { %1152 = vmatpush3.bf16.msra.mxu0 %v1219_v17  ;;  %1155 = vmatprep.mubr.msk.bf16.mxu0 %vm1266_vm2, %v1265_v18  ;;  %v1222_v23 = vld [vmem:[%s1380_s19] sm:$0xff]   ;;  %v1224_v24 = vld [vmem:[%s1380_s19 + $0x8] sm:$0xff]  }
 0x156   : > { %1153 = vmatprep.subr.bf16.mxu0 %v1265_v18  ;;  %1163 = vmatprep.mubr.msk.bf16.mxu1 %vm1266_vm2, %v1265_v18  ;;  %v1125_v25 = vld [vmem:[%s549_s25] ss:$0 sm:$0xff] }
 0x157   : > { %1160 = vmatpush3.bf16.msra.mxu1 %v1221_v20  ;;  %v1129_v27 = vld [vmem:[%s1496_s15] ss:$0 sm:$0xff] }
 0x158   : > { %1161 = vmatprep.subr.bf16.mxu1 %v1265_v18  ;;  %v1133_v40 = vld [vmem:[%s555_s3] ss:$0 sm:$0xff] }
 0x159   : > { %1154 = vmatpush3.bf16.msra.mxu0 %v1220_v19  ;;  %v629_v22 = vld [vmem:[#allocation2] sm:$0xf] }
 0x15a   : > { %1167 = vmatprep.subr.bf16.mxu0 %v1265_v18 }
 0x15b   : > { %1162 = vmatpush3.bf16.msra.mxu1 %v1223_v21 }
 0x15c   : > { %1156 = vmatmul.mubr.msk.bf16.vlgmr.msra.gmra.mrb[0].mxu0 %vm653_vm3, %v629_v22 }
 0x15d   : > { %1168 = vmatpush3.bf16.msra.mxu0 %v1222_v23  ;;  %1171 = vmatprep.mubr.msk.bf16.mxu0 %vm1266_vm2, %v1265_v18 }
 0x15e   : > { %1169 = vmatprep.subr.bf16.mxu0 %v1265_v18  ;;  %1164 = vmatmul.mubr.msk.bf16.vlgmr.msra.gmra.mrb[0].mxu1 %vm653_vm3, %v629_v22 }
 0x161   : > { %1170 = vmatpush3.bf16.msra.mxu0 %v1224_v24 }
 0x164   : > { %1172 = vmatmul.mubr.msk.bf16.vlgmr.msra.gmra.mrb[4].mxu0 %vm653_vm3, %v629_v22 }
 0x22f   : > { %v691_v26 = vpop.f32.mrb[0].mxu0 }
 0x230   : > { %v692_v28 = vadd.f32 %v1125_v25, %v691_v26  ;;  %v1157_v29 = vpop.f32.mrb[1].mxu0 }
 0x231   : > { %v694_v30 = vpop.f32.mrb[2].mxu0  ;;  %v758_v31 = vpop.f32.mrb[0].mxu1 }
 0x232   : > { %v697_v32 = vmul.f32 0.25, %v692_v28  ;;  %v1158_v33 = vpop.f32.mrb[3].mxu0  ;;  %v759_v34 = vadd.f32 %v1129_v27, %v758_v31  ;;  %v1165_v35 = vpop.f32.mrb[1].mxu1 }
 0x233   : > { %v761_v36 = vpop.f32.mrb[2].mxu1 }
 0x234   : > { %v698_v37 = vpack.c.bf16 %v697_v32, %v697_v32  ;;  %v764_v38 = vpack.c.bf16 %v759_v34, %v759_v34  ;;  %v1166_v39 = vpop.f32.mrb[3].mxu1 }
 0x236   : > { %700 = vst.msk [vmem:[%s566_s22] sm:$0xf] %vm699_vm4, %v698_v37  ;;  %765 = vst.msk [vmem:[%s577_s18] sm:$0xf] %vm699_vm4, %v764_v38 }
 0x237   : > { %v823_v41 = vpop.f32.mrb[4].mxu0 }
 0x238   : > { %v824_v42 = vadd.f32 %v1133_v40, %v823_v41  ;;  %v1173_v43 = vpop.f32.mrb[5].mxu0 }
 0x239   : > { %v826_v44 = vpop.f32.mrb[6].mxu0 }
 0x23a   : > { %v829_v45 = vpack.c.bf16 %v824_v42, %v824_v42  ;;  %v1174_v46 = vpop.f32.mrb[7].mxu0 }
 0x23c   : > { %830 = vst.msk [vmem:[%s588_s12] sm:$0xf] %vm699_vm4, %v829_v45 }
 0x23d PF: > { %s1497_s3 = sld [smem:[#allocation5_spill]]  ;;  %s1498_s17 = sld [smem:[#allocation3_spill]] }
 0x23e   : > { %s1499_s18 = sld [smem:[#allocation4_spill]]  ;;  %s1500_s19 = sld [smem:[#allocation6_spill]] }
 0x23f   : > { %s1501_s20 = sld [smem:[#allocation7_spill]] }
 0x243   : > { %s22_s21 = sadd.s32 1, %s1497_s3  }
 0x244   : > { %p19_p8 = scmp.ge.s32.totalorder %s22_s21, 6  }
 0x246   :  { %21 = sbr.rel (!%p19_p8) target bundleno = 4 (0x4), region = 132 }

// kernel: transformer_forward.20
= control target key start
LH: loop header
LB: loop body
LE: loop exit
PB: predicated region body
PF: predicated region fallthrough
CT: control target
= control target key end

     0   :  { %s615_s15 = smov 0   ;;  %s617_s16 = smov 0   ;;  %s680_s0 = inlined_call_operand.vmem [shape: bf16[2,2,8,16], index: 0, kind: input, shape index: {}]   ;;  %s681_s1 = inlined_call_operand.vmem [shape: bf16[2,16,32], index: 1, kind: input, shape index: {}]   ;;  %s682_s2 = inlined_call_operand.vmem [shape: f32[1,1,32], index: 2, kind: input, shape index: {}]   ;;  %s683_s3 = inlined_call_operand.vmem [shape: f32[2,8,32], index: 3, kind: input, shape index: {}]   ;;  %s684_s4 = inlined_call_operand.vmem [shape: f32[2,8,32], index: 4, kind: output, shape index: {}]  }
   0x1   :  { %s619_s17 = smov 0   ;;  %s621_s18 = smov 0  }
   0x2   :  { %s623_s19 = smov 0  }
   0x3 LB: > { %s26_s20 = sadd.s32 1, %s578_s17  ;;  %s33_s21 = sadd.s32 1, %s582_s18  ;;  %s586_s19 = sphi %s623_s19, %s14_s19   ;;  %s582_s18 = sphi %s621_s18, %s688_s18   ;;  %s578_s17 = sphi %s619_s17, %s687_s17   ;;  %s574_s16 = sphi %s617_s16, %s686_s16   ;;  %s570_s15 = sphi %s615_s15, %s685_s15  }
   0x4   : > { %p27_p0 = scmp.ge.s32.totalorder %s26_s20, 2  ;;  %p483_p1 = scmp.ge.s32.totalorder %s586_s19, 1 }
   0x5   : > { %p217_p2 = scmp.lt.s32.totalorder %s586_s19, 5 }
   0x6   : > { %s690_s20 = smov (%p27_p0, %s26_s20), 0  ;;  %s692_s21 = smov (!%p27_p0, %s33_s21), %s582_s18 }
   0x7   : > { %p218_p3 = pnand %p483_p1, %p217_p2  ;;  %p35_p4 = scmp.ge.s32.totalorder %s692_s21, 2 }
   0x8   : > { %p263_p5 = scmp.lt.s32.totalorder (!%p218_p3), %s574_s16, 1  ;;  %p265_p6 = scmp.lt.s32.totalorder (!%p218_p3), %s570_s15, 1 }
   0x9   : > { %s694_s21 = smov (%p35_p4, %s692_s21), 0  ;;  %221 = sbr.rel (%p218_p3) target bundleno = 246 (0xf6), region = 36 }
   0xa   : > { %p490_p7 = scmp.ne.s32.totalorder (!%p218_p3), %s570_s15, 0 }
  0x10   : > { %s696_s16 = smov (!%p263_p5, %s574_s16), 1  ;;  %297 = sbr.rel (%p490_p7) target bundleno = 26 (0x1a), region = 40 }
  0x11   : > { %s266_s22 = scalar_select %p265_p6, %s570_s15, 1 }
  0x12   : > { %s484_s23 = sshll.u32 %s696_s16, 1  ;;  %s488_s24 = sshll.u32 %s696_s16, 3  ;;  %v491_v1 = vld [vmem:[%s682_s2] ss:$0 sm:$0xff] (!%p490_p7)  ;;  %vm307_vm0 = vcmask (!%p490_p7), 261120  }
  0x13   : > { %s271_s25 = sadd.s32 %s484_s23, %s266_s22  ;;  %s496_s26 = sshll.u32 %s266_s22, 3 }
  0x14   : > { %s485_s27 = sshll.u32 %s271_s25, 2  ;;  %s278_s30 = scalar_lea.vmem %s681_s1, %s496_s26 }
  0x15   : > { %s273_s7 = scalar_lea.vmem %s680_s0, %s485_s27  ;;  %s285_s10 = scalar_lea.vmem %s683_s3, %s488_s24 }
  0x16   : > { %s292_s13 = scalar_lea.vmem %s684_s4, %s488_s24  ;;  %v298_v0 = vld [vmem:[%s285_s10] sm:$0xff] (!%p490_p7) }
  0x17   : > { %v306_v2 = vadd.f32 %v491_v1, %v298_v0 }
  0x19   : > { %308 = vst.msk [vmem:[%s292_s13] sm:$0xff] %vm307_vm0, %v306_v2 }
  0x1a PF: > { %v547_v3 = vld [vmem:[%s278_s30] sm:$0xff]   ;;  %v588_v4 = vmov 0.0   ;;  %vm589_vm1 = vmmov 0   ;;  %vm318_vm2 = vcmask 130048   ;;  %vm364_vm3 = vcmask 261120  }
  0x1b   : > { %499 = vmatprep.subr.bf16.mxu0 %v588_v4  ;;  %501 = vmatprep.mubr.msk.bf16.mxu0 %vm589_vm1, %v588_v4  ;;  %v309_v5 = vld [vmem:[%s273_s7] sm:$0xf] }
  0x1c   : > { %500 = vmatpush3.bf16.msra.mxu0 %v547_v3 }
  0x1f   : > { %502 = vmatmul.mubr.msk.bf16.vlgmr.msra.gmra.mrb[0].mxu0 %vm318_vm2, %v309_v5 }
  0x20   : > { %v362_v6 = vld [vmem:[%s292_s13] sm:$0xff] }
  0xf2   : > { %v356_v7 = vpop.f32.mrb[0].mxu0 }
  0xf3   : > { %v363_v8 = vadd.f32 %v362_v6, %v356_v7  ;;  %v503_v9 = vpop.f32.mrb[1].mxu0 }
  0xf4   : > { %v359_v10 = vpop.f32.mrb[2].mxu0 }
  0xf5   : > { %365 = vst.msk [vmem:[%s292_s13] sm:$0xff] %vm364_vm3, %v363_v8  ;;  %v504_v11 = vpop.f32.mrb[3].mxu0 }
  0xf6 PF: > { %s14_s19 = sadd.s32 1, %s586_s19   ;;  %s685_s15 = smov %s578_s17 }
  0xf7   : > { %p11_p8 = scmp.ge.s32.totalorder %s14_s19, 6   ;;  %s686_s16 = smov %s582_s18 }
  0xf8   : > { %s687_s17 = smov %s690_s20  ;;  %s688_s18 = smov %s694_s21 }
  0xf9   :  { %13 = sbr.rel (!%p11_p8) target bundleno = 3 (0x3), region = 76 }

// kernel: transformer_forward.19
= control target key start
LH: loop header
LB: loop body
LE: loop exit
PB: predicated region body
PF: predicated region fallthrough
CT: control target
= control target key end

     0   :  { %s790_s12 = smov 0   ;;  %s792_s13 = smov 0   ;;  %s864_s0 = inlined_call_operand.vmem [shape: bf16[2,2,8,16], index: 0, kind: input, shape index: {}]   ;;  %s865_s1 = inlined_call_operand.vmem [shape: bf16[2,2,8,16], index: 1, kind: input, shape index: {}]   ;;  %s866_s2 = inlined_call_operand.vmem [shape: bf16[2,2,8,16], index: 2, kind: input, shape index: {}]   ;;  %s867_s3 = inlined_call_operand.vmem [shape: bf16[2,2,8,16], index: 3, kind: output, shape index: {}]  }
   0x1   :  { %s794_s14 = smov 0   ;;  %s796_s15 = smov 0  }
   0x2   :  { %s798_s16 = smov 0  }
   0x3 LB: > { %s35_s17 = sadd.s32 1, %s756_s14  ;;  %s39_s18 = sadd.s32 1, %s760_s15  ;;  %s764_s16 = sphi %s798_s16, %s13_s16   ;;  %s760_s15 = sphi %s796_s15, %s871_s15   ;;  %s756_s14 = sphi %s794_s14, %s870_s14   ;;  %s752_s13 = sphi %s792_s13, %s869_s13   ;;  %s748_s12 = sphi %s790_s12, %s868_s12  }
   0x4   : > { %p37_p0 = scmp.ge.s32.totalorder %s35_s17, 2  ;;  %p645_p1 = scmp.ge.s32.totalorder %s764_s16, 1 }
   0x5   : > { %p217_p2 = scmp.lt.s32.totalorder %s764_s16, 5 }
   0x6   : > { %s873_s17 = smov (%p37_p0, %s35_s17), 0  ;;  %s875_s18 = smov (!%p37_p0, %s39_s18), %s760_s15 }
   0x7   : > { %p218_p3 = pnand %p645_p1, %p217_p2  ;;  %p41_p4 = scmp.ge.s32.totalorder %s875_s18, 2 }
   0x8   : > { %p275_p5 = scmp.lt.s32.totalorder (!%p218_p3), %s752_s13, 1  ;;  %p277_p6 = scmp.lt.s32.totalorder (!%p218_p3), %s748_s12, 1  ;;  %vm327_vm0 = vcmask (!%p218_p3), 130048   ;;  %v766_v0 = vmov (!%p218_p3), 0.0   ;;  %vm767_vm1 = vmmov (!%p218_p3), 0   ;;  %vm324_vm2 = vcmask (!%p218_p3), 7168  }
   0x9   : > { %s877_s18 = smov (%p41_p4, %s875_s18), 0  ;;  %221 = sbr.rel (%p218_p3) target bundleno = 828 (0x33c), region = 32 }
   0xa   : > { %662 = vmatprep.subr.bf16.mxu0 (!%p218_p3), %v766_v0  ;;  %328 = vst.msk [vmem:[#allocation4] sm:$0xff] (!%p218_p3), %vm327_vm0, %v766_v0  ;;  %664 = vmatprep.mubr.msk.bf16.mxu0 (!%p218_p3), %vm767_vm1, %v766_v0  ;;  %v768_v4 = vmov (!%p218_p3), -inf   ;;  %v385_v5 = vlaneseq (!%p218_p3)  ;;  %vm396_vm4 = vcmask (!%p218_p3), 64512   ;;  %v769_v14 = vmov (!%p218_p3), 0  }
   0xb   : > { %668 = vmatprep.subr.bf16.mxu1 (!%p218_p3), %v766_v0  ;;  %670 = vmatprep.mubr.msk.bf16.mxu1 (!%p218_p3), %vm767_vm1, %v766_v0  ;;  %325 = vst.msk [vmem:[#allocation2] sm:$0xff] (!%p218_p3), %vm324_vm2, %v768_v4  ;;  %326 = vst.msk [vmem:[#allocation3] sm:$0xff] (!%p218_p3), %vm324_vm2, %v766_v0  ;;  %vm432_vm5 = vcmask (!%p218_p3), 1043456   ;;  %vm492_vm6 = vcmask (!%p218_p3), 125952  }
   0xc   : > { %v386_v6 = vshrl.u32 (!%p218_p3), %v385_v5, 7  ;;  %v390_v7 = vand.u32 (!%p218_p3), 127, %v385_v5  ;;  %718 = vset.pattern.permute.xlu0 (!%p218_p3), %v769_v14  ;;  %719 = vset.pattern.permute.xlu1 (!%p218_p3), %v769_v14 }
   0xe   : > { %vm393_vm3 = vcmp.le.s32.totalorder (!%p218_p3), %v390_v7, %v386_v6 }
  0x10   : > { %s879_s13 = smov (!%p275_p5, %s752_s13), 1  ;;  %s881_s12 = smov (!%p277_p6, %s748_s12), 1 }
  0x11   : > { %s646_s19 = sshll.u32 %s879_s13, 1  ;;  %v420_v35 = vld [vmem:[#allocation4] sm:$0xff] }
  0x12   : > { %s283_s20 = sadd.s32 %s646_s19, %s881_s12  ;;  %v395_v15 = vld [vmem:[#allocation2] sm:$0xff]  ;;  %v412_v29 = vld [vmem:[#allocation3] sm:$0xff] }
  0x13   : > { %s821_s21 = sshll.u32 %s283_s20, 2 }
  0x14   : > { %s296_s24 = scalar_lea.vmem %s865_s1, %s821_s21  ;;  %s285_s27 = scalar_lea.vmem %s864_s0, %s821_s21 }
  0x15   : > { %v337_v1 = vld [vmem:[%s296_s24] sm:$0xf]  ;;  %s307_s30 = scalar_lea.vmem %s866_s2, %s821_s21  ;;  %s318_s6 = scalar_lea.vmem %s867_s3, %s821_s21 }
  0x16   : > { %v343_v2 = vsel %vm327_vm0, %v337_v1, 0  ;;  %v336_v3 = vld [vmem:[%s285_s27] sm:$0xf] }
  0x17   : > { %663 = vmatpush3.bf16.xpose.msra.mxu0 %v343_v2  ;;  %v428_v19 = vld [vmem:[%s307_s30] sm:$0xf] }
  0x18   : > { %v434_v20 = vsel %vm432_vm5, %v428_v19, 0 }
  0x19   : > { %669 = vmatpush3.bf16.msra.mxu1 %v434_v20 }
  0x1e   : > { %665 = vmatmul.mubr.msk.bf16.vlgmr.msra.gmra.mrb[0].mxu0 %vm327_vm0, %v336_v3 }
  0xf1   : > { %v379_v8 = vpop.f32.mrb[0].mxu0 }
  0xf2   : > { %v394_v9 = vsel %vm393_vm3, %v379_v8, -1e+30  ;;  %v666_v10 = vpop.f32.mrb[1].mxu0 }
  0xf3   : > { %v382_v11 = vpop.f32.mrb[2].mxu0  ;;  %v397_v12 = vsel %vm396_vm4, %v394_v9, -inf }
  0xf4   : > { %398 = vmax.xlane.f32.xlu0 %v397_v12  ;;  %v667_v13 = vpop.f32.mrb[3].mxu0 }
 0x181   : > { %v399_v16 = vpop.xlane.xlu0 %398 }
 0x182   : > { %v400_v17 = vmax.f32 %v395_v15, %v399_v16 }
 0x184   : > { %v401_v18 = vsub.f32 %v395_v15, %v400_v17  ;;  %478 = vst.msk [vmem:[#allocation2] sm:$0xff] %vm324_vm2, %v400_v17  ;;  %406 = vperm.xlu0 %718, %v400_v17  }
 0x186   : > { %v402_v27 = vmul.f32 1.442695, %v401_v18 }
 0x203   : > { %v407_v21 = vpop.permute.xlu0 %406 }
 0x204   : > { %v409_v22 = vsub.f32 %v394_v9, %v407_v21 }
 0x206   : > { %v410_v23 = vmul.f32 1.442695, %v409_v22 }
 0x208   : > { %720 = vpow2.f32 %v410_v23 }
 0x209   : > { %722 = vpow2.f32 %v402_v27 }
 0x212   : > { %v721_v24 = vpop.eup %720 }
 0x213   : > { %v414_v25 = vsel %vm396_vm4, %v721_v24, 0.0  ;;  %v427_v26 = vpack.c.bf16 %v721_v24, %v721_v24  ;;  %v723_v28 = vpop.eup %722 }
 0x214   : > { %415 = vadd.xlane.f32.xlu1 %v414_v25  ;;  %v413_v30 = vmul.f32 %v723_v28, %v412_v29 }
 0x215   : > { %671 = vmatmul.mubr.msk.bf16.vlgmr.msra.gmra.mrb[0].mxu1 %vm396_vm4, %v427_v26 }
 0x225   : > { %423 = vperm.xlu1 %719, %v723_v28  }
 0x2a1   : > { %v416_v31 = vpop.xlane.xlu1 %415 }
 0x2a2   : > { %v417_v32 = vadd.f32 %v416_v31, %v413_v30 }
 0x2a4   : > { %419 = vst.msk [vmem:[#allocation3] sm:$0xff] %vm324_vm2, %v417_v32 }
 0x2a5   : > { %v424_v36 = vpop.permute.xlu1 %423 }
 0x2a6   : > { %v426_v37 = vmul.f32 %v424_v36, %v420_v35 }
 0x2ab   : > { %v482_v33 = vld [vmem:[#allocation3] sm:$0xff] }
 0x2ac   : > { %724 = vrcp.f32 %v482_v33 }
 0x2b6   : > { %v725_v34 = vpop.eup %724 }
 0x2b7   : > { %487 = vperm.xlu1 %719, %v725_v34  }
 0x2e8   : > { %v470_v38 = vpop.f32.mrb[0].mxu1 }
 0x2e9   : > { %v476_v39 = vadd.f32 %v470_v38, %v426_v37  ;;  %v672_v40 = vpop.f32.mrb[1].mxu1 }
 0x2ea   : > { %v473_v41 = vpop.f32.mrb[2].mxu1 }
 0x2eb   : > { %477 = vst.msk [vmem:[#allocation4] sm:$0xff] %vm327_vm0, %v476_v39  ;;  %v673_v42 = vpop.f32.mrb[3].mxu1 }
 0x2f2   : > { %v484_v43 = vld [vmem:[#allocation4] sm:$0xff] }
 0x336   : > { %v488_v44 = vpop.permute.xlu1 %487 }
 0x337   : > { %v490_v45 = vmul.f32 %v488_v44, %v484_v43 }
 0x339   : > { %v491_v46 = vpack.c.bf16 %v490_v45, %v490_v45 }
 0x33b   : > { %493 = vst.msk [vmem:[%s318_s6] sm:$0xf] %vm492_vm6, %v491_v46 }
 0x33c PF: > { %s13_s16 = sadd.s32 1, %s764_s16   ;;  %s868_s12 = smov %s756_s14 }
 0x33d   : > { %p10_p7 = scmp.ge.s32.totalorder %s13_s16, 6   ;;  %s869_s13 = smov %s760_s15 }
 0x33e   : > { %s870_s14 = smov %s873_s17  ;;  %s871_s15 = smov %s877_s18 }
 0x33f   :  { %12 = sbr.rel (!%p10_p7) target bundleno = 3 (0x3), region = 80 }

// kernel: transformer_forward.22
= control target key start
LH: loop header
LB: loop body
LE: loop exit
PB: predicated region body
PF: predicated region fallthrough
CT: control target
= control target key end

     0   :  { %v199_v0 = vmov 0.0   ;;  %vm200_vm0 = vmmov 0   ;;  %vm142_vm1 = vcmask 261120   ;;  %s268_s1 = inlined_call_operand.vmem [shape: bf16[128,32], index: 1, kind: input, shape index: {}]   ;;  %s269_s0 = inlined_call_operand.vmem [shape: bf16[16,128], index: 0, kind: input, shape index: {}]   ;;  %s270_s2 = inlined_call_operand.vmem [shape: f32[1,32], index: 2, kind: input, shape index: {}]   ;;  %s271_s3 = inlined_call_operand.vmem [shape: f32[16,32], index: 3, kind: input, shape index: {}]   ;;  %s272_s4 = inlined_call_operand.vmem [shape: f32[16,32], index: 4, kind: output, shape index: {}]  }
   0x1   :  { %168 = vmatprep.subr.bf16.mxu0 %v199_v0  ;;  %v190_v1 = vld [vmem:[%s268_s1] sm:$0xff]   ;;  %184 = vmatprep.mubr.msk.bf16.mxu0 %vm200_vm0, %v199_v0  ;;  %v191_v2 = vld [vmem:[%s268_s1 + $0x8] sm:$0xff]   ;;  %v192_v3 = vld [vmem:[%s268_s1 + $0x10] sm:$0xff]  }
   0x2   :  { %169 = vmatpush3.bf16.msra.mxu0 %v190_v1  ;;  %v193_v4 = vld [vmem:[%s268_s1 + $0x18] sm:$0xff]   ;;  %v194_v5 = vld [vmem:[%s268_s1 + $0x20] sm:$0xff]   ;;  %v195_v6 = vld [vmem:[%s268_s1 + $0x28] sm:$0xff]  }
   0x3   :  { %170 = vmatprep.subr.bf16.mxu0 %v199_v0  ;;  %v196_v7 = vld [vmem:[%s268_s1 + $0x30] sm:$0xff]   ;;  %v197_v8 = vld [vmem:[%s268_s1 + $0x38] sm:$0xff]   ;;  %v198_v9 = vld [vmem:[%s269_s0] sm:$0xff]  }
   0x4   :  { %v149_v10 = vld [vmem:[%s270_s2] ss:$0 sm:$0xff]  ;;  %v139_v16 = vld [vmem:[%s271_s3 + $0x8] sm:$0xff] }
   0x5   :  { %v138_v12 = vld [vmem:[%s271_s3] sm:$0xff] }
   0x6   :  { %171 = vmatpush3.bf16.msra.mxu0 %v191_v2 }
   0x7   :  { %172 = vmatprep.subr.bf16.mxu0 %v199_v0 }
   0xa   :  { %173 = vmatpush3.bf16.msra.mxu0 %v192_v3 }
   0xb   :  { %174 = vmatprep.subr.bf16.mxu0 %v199_v0 }
   0xe   :  { %175 = vmatpush3.bf16.msra.mxu0 %v193_v4 }
   0xf   :  { %176 = vmatprep.subr.bf16.mxu0 %v199_v0 }
  0x12   :  { %177 = vmatpush3.bf16.msra.mxu0 %v194_v5 }
  0x13   :  { %178 = vmatprep.subr.bf16.mxu0 %v199_v0 }
  0x16   :  { %179 = vmatpush3.bf16.msra.mxu0 %v195_v6 }
  0x17   :  { %180 = vmatprep.subr.bf16.mxu0 %v199_v0 }
  0x1a   :  { %181 = vmatpush3.bf16.msra.mxu0 %v196_v7 }
  0x1b   :  { %182 = vmatprep.subr.bf16.mxu0 %v199_v0 }
  0x1e   :  { %183 = vmatpush3.bf16.msra.mxu0 %v197_v8 }
  0x21   :  { %185 = vmatmul.mubr.bf16.vlgmr.msra.gmra.mrb[0].mxu0 %v198_v9 }
  0xf4   :  { %v131_v11 = vpop.f32.mrb[0].mxu0 }
  0xf5   :  { %v132_v13 = vadd.f32 %v149_v10, %v131_v11  ;;  %v186_v14 = vpop.f32.mrb[1].mxu0 }
  0xf6   :  { %v134_v15 = vpop.f32.mrb[2].mxu0 }
  0xf7   :  { %v140_v17 = vadd.f32 %v138_v12, %v132_v13  ;;  %v135_v18 = vadd.f32 %v149_v10, %v134_v15  ;;  %v187_v19 = vpop.f32.mrb[3].mxu0 }
  0xf9   :  { %143 = vst.msk [vmem:[%s272_s4] sm:$0xff] %vm142_vm1, %v140_v17  ;;  %v141_v20 = vadd.f32 %v139_v16, %v135_v18 }
  0xfb   :  { %144 = vst.msk [vmem:[%s272_s4 + $0x8] sm:$0xff] %vm142_vm1, %v141_v20 }

// kernel: transformer_forward.33
= control target key start
LH: loop header
LB: loop body
LE: loop exit
PB: predicated region body
PF: predicated region fallthrough
CT: control target
= control target key end

     0   :  { %s267_s0 = inlined_call_operand.vmem [shape: f32[2,32], index: 0, kind: input, shape index: {}]   ;;  %s268_s1 = inlined_call_operand.vmem [shape: bf16[32,1], index: 1, kind: input, shape index: {}]   ;;  %s269_s2 = inlined_call_operand.<no memory space> [shape: f32[1,1], index: 2, kind: input, shape index: {}]   ;;  %s270_s3 = inlined_call_operand.vmem [shape: f32[1,32], index: 3, kind: input, shape index: {}]   ;;  %s271_s4 = inlined_call_operand.vmem [shape: f32[1,32], index: 4, kind: input, shape index: {}]   ;;  %s272_s5 = inlined_call_operand.vmem [shape: f32[2,1], index: 5, kind: output, shape index: {}]  }
   0x1   :  { %v10_v0 = vstv %s269_s2 }
   0x2   :  { %11 = vst [vmem:[#allocation2] sm:$0x1] %v10_v0 }
   0x3   :  { %v23_v1 = vld [vmem:[%s267_s0] sm:$0xff]  ;;  %vm27_vm0 = vcmask 261120   ;;  %v24_v2 = vld [vmem:[%s267_s0 + $0x8] sm:$0xff]  ;;  %v206_v16 = vmov 0.0   ;;  %vm207_vm1 = vmmov 0   ;;  %vm139_vm2 = vcmask 7168  }
   0x4   :  { %v28_v3 = vsel %vm27_vm0, %v23_v1, 0.0  ;;  %v31_v4 = vsel %vm27_vm0, %v24_v2, 0.0  ;;  %v200_v15 = vld [vmem:[%s268_s1] sm:$0xff]   ;;  %190 = vmatprep.subr.bf16.mxu0 %v206_v16  ;;  %v201_v17 = vld [vmem:[%s268_s1 + $0x8] sm:$0xff]   ;;  %194 = vmatprep.mubr.msk.bf16.mxu0 %vm207_vm1, %v206_v16 }
   0x5   :  { %29 = vadd.xlane.f32.xlu0 %v28_v3  ;;  %191 = vmatpush3.bf16.msra.mxu0 %v200_v15  ;;  %v181_v26 = vld [vmem:[%s270_s3] ss:$0 sm:$0xff] }
   0x6   :  { %192 = vmatprep.subr.bf16.mxu0 %v206_v16  ;;  %v182_v30 = vld [vmem:[%s271_s4] ss:$0 sm:$0xff] }
   0x9   :  { %32 = vadd.xlane.f32.xlu0 %v31_v4  ;;  %193 = vmatpush3.bf16.msra.mxu0 %v201_v17  ;;  %v183_v35 = vld [vmem:[#allocation2] ss:$0 sm:$0xff] }
  0x92   :  { %v30_v5 = vpop.xlane.xlu0 %29 }
  0x93   :  { %v35_v6 = vmul.f32 0.03125, %v30_v5 }
  0x95   :  { %v37_v7 = vsub.f32 %v23_v1, %v35_v6 }
  0x96   :  { %v33_v8 = vpop.xlane.xlu0 %32 }
  0x97   :  { %v36_v9 = vmul.f32 0.03125, %v33_v8  ;;  %v39_v10 = vmul.f32 %v37_v7, %v37_v7 }
  0x99   :  { %v38_v11 = vsub.f32 %v24_v2, %v36_v9  ;;  %v41_v12 = vsel %vm27_vm0, %v39_v10, 0.0 }
  0x9a   :  { %42 = vadd.xlane.f32.xlu1 %v41_v12 }
  0x9b   :  { %v40_v13 = vmul.f32 %v38_v11, %v38_v11 }
  0x9d   :  { %v44_v14 = vsel %vm27_vm0, %v40_v13, 0.0 }
  0x9e   :  { %45 = vadd.xlane.f32.xlu1 %v44_v14 }
 0x127   :  { %v43_v18 = vpop.xlane.xlu1 %42 }
 0x128   :  { %v47_v19 = vmul.f32 0.03125, %v43_v18 }
 0x12a   :  { %v49_v20 = vadd.f32 1e-05, %v47_v19 }
 0x12b   :  { %v46_v21 = vpop.xlane.xlu1 %45 }
 0x12c   :  { %202 = vrsqrt.f32 %v49_v20  ;;  %v48_v22 = vmul.f32 0.03125, %v46_v21 }
 0x12e   :  { %v50_v23 = vadd.f32 1e-05, %v48_v22 }
 0x130   :  { %204 = vrsqrt.f32 %v50_v23 }
 0x136   :  { %v203_v24 = vpop.eup %202 }
 0x137   :  { %v53_v25 = vmul.f32 %v203_v24, %v37_v7 }
 0x139   :  { %v61_v29 = vmul.f32 %v181_v26, %v53_v25 }
 0x13a   :  { %v205_v27 = vpop.eup %204 }
 0x13b   :  { %v54_v28 = vmul.f32 %v205_v27, %v38_v11  ;;  %v69_v32 = vadd.f32 %v182_v30, %v61_v29 }
 0x13d   :  { %v62_v31 = vmul.f32 %v181_v26, %v54_v28 }
 0x13f   :  { %v70_v33 = vadd.f32 %v182_v30, %v62_v31 }
 0x141   :  { %v71_v34 = vpack.c.bf16 %v70_v33, %v69_v32 }
 0x143   :  { %195 = vmatmul.mubr.msk.bf16.vlgmr.msra.gmra.mrb[0].mxu0 %vm27_vm0, %v71_v34 }
 0x216   :  { %v132_v36 = vpop.f32.mrb[0].mxu0 }
 0x217   :  { %v133_v37 = vadd.f32 %v183_v35, %v132_v36  ;;  %v196_v38 = vpop.f32.mrb[1].mxu0 }
 0x218   :  { %v135_v39 = vpop.f32.mrb[2].mxu0 }
 0x219   :  { %140 = vst.msk [vmem:[#allocation3] sm:$0xff] %vm139_vm2, %v133_v37  ;;  %v197_v40 = vpop.f32.mrb[3].mxu0 }
 0x220   :  { %v159_v41 = vld [vmem:[#allocation3] sm:$0x3] }
 0x221   :  { %160 = vst [vmem:[%s272_s5] sm:$0x3] %v159_v41 }

// kernel: transformer_forward.21
= control target key start
LH: loop header
LB: loop body
LE: loop exit
PB: predicated region body
PF: predicated region fallthrough
CT: control target
= control target key end

     0   :  { %vm25_vm0 = vcmask 261120   ;;  %v207_v15 = vmov 0.0   ;;  %vm208_vm1 = vmmov 0   ;;  %s268_s0 = inlined_call_operand.vmem [shape: f32[16,32], index: 0, kind: input, shape index: {}]   ;;  %s269_s1 = inlined_call_operand.vmem [shape: bf16[32,128], index: 1, kind: input, shape index: {}]   ;;  %s270_s3 = inlined_call_operand.vmem [shape: f32[1,32], index: 3, kind: input, shape index: {}]   ;;  %s271_s4 = inlined_call_operand.vmem [shape: f32[1,32], index: 4, kind: input, shape index: {}]   ;;  %s272_s2 = inlined_call_operand.vmem [shape: f32[1,128], index: 2, kind: input, shape index: {}]   ;;  %s273_s5 = inlined_call_operand.vmem [shape: bf16[16,128], index: 5, kind: output, shape index: {}]  }
   0x1   :  { %v21_v0 = vld [vmem:[%s268_s0] sm:$0xff]  ;;  %v22_v1 = vld [vmem:[%s268_s0 + $0x8] sm:$0xff]  ;;  %187 = vmatprep.subr.bf16.mxu0 %v207_v15  ;;  %191 = vmatprep.mubr.msk.bf16.mxu0 %vm208_vm1, %v207_v15 }
   0x2   :  { %v26_v2 = vsel %vm25_vm0, %v21_v0, 0.0  ;;  %v29_v3 = vsel %vm25_vm0, %v22_v1, 0.0  ;;  %v197_v14 = vld [vmem:[%s269_s1] sm:$0xff]   ;;  %v198_v16 = vld [vmem:[%s269_s1 + $0x8] sm:$0xff]  }
   0x3   :  { %27 = vadd.xlane.f32.xlu0 %v26_v2  ;;  %188 = vmatpush3.bf16.msra.mxu0 %v197_v14  ;;  %v169_v25 = vld [vmem:[%s270_s3] ss:$0 sm:$0xff] }
   0x4   :  { %189 = vmatprep.subr.bf16.mxu0 %v207_v15  ;;  %v170_v29 = vld [vmem:[%s271_s4] ss:$0 sm:$0xff] }
   0x5   :  { %v171_v34 = vld [vmem:[%s272_s2] ss:$0 sm:$0xff] }
   0x7   :  { %30 = vadd.xlane.f32.xlu0 %v29_v3  ;;  %190 = vmatpush3.bf16.msra.mxu0 %v198_v16 }
  0x90   :  { %v28_v4 = vpop.xlane.xlu0 %27 }
  0x91   :  { %v33_v5 = vmul.f32 0.03125, %v28_v4 }
  0x93   :  { %v35_v6 = vsub.f32 %v21_v0, %v33_v5 }
  0x94   :  { %v31_v7 = vpop.xlane.xlu0 %30 }
  0x95   :  { %v34_v8 = vmul.f32 0.03125, %v31_v7  ;;  %v37_v9 = vmul.f32 %v35_v6, %v35_v6 }
  0x97   :  { %v36_v10 = vsub.f32 %v22_v1, %v34_v8  ;;  %v39_v11 = vsel %vm25_vm0, %v37_v9, 0.0 }
  0x98   :  { %40 = vadd.xlane.f32.xlu1 %v39_v11 }
  0x99   :  { %v38_v12 = vmul.f32 %v36_v10, %v36_v10 }
  0x9b   :  { %v42_v13 = vsel %vm25_vm0, %v38_v12, 0.0 }
  0x9c   :  { %43 = vadd.xlane.f32.xlu1 %v42_v13 }
 0x125   :  { %v41_v17 = vpop.xlane.xlu1 %40 }
 0x126   :  { %v45_v18 = vmul.f32 0.03125, %v41_v17 }
 0x128   :  { %v47_v19 = vadd.f32 1e-05, %v45_v18 }
 0x129   :  { %v44_v20 = vpop.xlane.xlu1 %43 }
 0x12a   :  { %199 = vrsqrt.f32 %v47_v19  ;;  %v46_v21 = vmul.f32 0.03125, %v44_v20 }
 0x12c   :  { %v48_v22 = vadd.f32 1e-05, %v46_v21 }
 0x12e   :  { %201 = vrsqrt.f32 %v48_v22 }
 0x134   :  { %v200_v23 = vpop.eup %199 }
 0x135   :  { %v51_v24 = vmul.f32 %v200_v23, %v35_v6 }
 0x137   :  { %v59_v28 = vmul.f32 %v169_v25, %v51_v24 }
 0x138   :  { %v202_v26 = vpop.eup %201 }
 0x139   :  { %v52_v27 = vmul.f32 %v202_v26, %v36_v10  ;;  %v67_v31 = vadd.f32 %v170_v29, %v59_v28 }
 0x13b   :  { %v60_v30 = vmul.f32 %v169_v25, %v52_v27 }
 0x13d   :  { %v68_v32 = vadd.f32 %v170_v29, %v60_v30 }
 0x13f   :  { %v69_v33 = vpack.c.bf16 %v68_v32, %v67_v31 }
 0x141   :  { %192 = vmatmul.mubr.msk.bf16.vlgmr.msra.gmra.mrb[0].mxu0 %vm25_vm0, %v69_v33 }
 0x214   :  { %v130_v35 = vpop.f32.mrb[0].mxu0 }
 0x215   :  { %v131_v36 = vadd.f32 %v171_v34, %v130_v35  ;;  %v193_v37 = vpop.f32.mrb[1].mxu0 }
 0x216   :  { %v133_v38 = vpop.f32.mrb[2].mxu0 }
 0x217   :  { %v139_v39 = vmul.f32 0.044715, %v131_v36  ;;  %v134_v40 = vadd.f32 %v171_v34, %v133_v38  ;;  %v194_v41 = vpop.f32.mrb[3].mxu0  ;;  %v137_v54 = vmul.f32 0.5, %v131_v36 }
 0x219   :  { %v141_v42 = vmul.f32 %v139_v39, %v131_v36  ;;  %v140_v43 = vmul.f32 0.044715, %v134_v40  ;;  %v138_v55 = vmul.f32 0.5, %v134_v40 }
 0x21b   :  { %v143_v44 = vmul.f32 %v141_v42, %v131_v36  ;;  %v142_v45 = vmul.f32 %v140_v43, %v134_v40 }
 0x21d   :  { %v145_v46 = vadd.f32 %v143_v44, %v131_v36  ;;  %v144_v47 = vmul.f32 %v142_v45, %v134_v40 }
 0x21f   :  { %v147_v48 = vmul.f32 0.7978846, %v145_v46  ;;  %v146_v49 = vadd.f32 %v144_v47, %v134_v40 }
 0x221   :  { %203 = vtanh.f32 %v147_v48  ;;  %v148_v50 = vmul.f32 0.7978846, %v146_v49 }
 0x223   :  { %205 = vtanh.f32 %v148_v50 }
 0x22b   :  { %v204_v51 = vpop.eup %203 }
 0x22c   :  { %v151_v52 = vadd.f32 1.0, %v204_v51 }
 0x22d   :  { %v206_v53 = vpop.eup %205 }
 0x22e   :  { %v152_v56 = vadd.f32 1.0, %v206_v53  ;;  %v153_v57 = vmul.f32 %v151_v52, %v137_v54 }
 0x230   :  { %v154_v58 = vmul.f32 %v152_v56, %v138_v55 }
 0x232   :  { %v182_v59 = vpack.c.bf16 %v154_v58, %v153_v57 }
 0x234   :  { %183 = vst [vmem:[%s273_s5] sm:$0xff] %v182_v59  }

</bundles_post_ra>
